<compile_context>
chip_gen: v7x
topology: tpu7x:2x2x1
jax: 0.10.0
libtpu: 0.0.40
codegen_flags: <defaults>
</compile_context>

<pallas_src>
import jax
import jax.numpy as jnp
from jax import lax
from jax.experimental import pallas as pl
from jax.experimental.pallas import tpu as pltpu


def _round_up(x, m):
    return ((x + m - 1) // m) * m


def _num_tensorcores():
    """2 TensorCores per chip on v7x, 1 on v5e/v6e (best-effort detection)."""
    try:
        kind = jax.devices()[0].device_kind.lower()
    except Exception:
        return 1
    return 2 if ("v7" in kind or "tpu7" in kind or "tpu 7" in kind) else 1


def _choose_tile(n, e, num_tc):
    """Rows per grid step: ~1 step per TensorCore, capped by a VMEM budget."""
    n_pad = _round_up(n, 128)
    # VMEM budget for the double-buffered f32 input tiles (2 inputs x 2 buffers):
    # keep them within ~8 MiB so even v5e's 16 MiB default scoped VMEM is safe.
    cap = max(128, ((8 << 20) // (2 * 2 * e * 4)) // 128 * 128)
    steps = max(num_tc, pl.cdiv(n_pad, cap))
    if num_tc > 1:
        # v7x: keep the number of grid steps a multiple of num_tc so the "parallel"
        # axis splits evenly across both TensorCores.
        steps = _round_up(steps, num_tc)
    tile = min(cap, _round_up(pl.cdiv(n_pad, steps), 128))
    return tile


def _make_kernel(b2_in_smem):
    def kernel(i_ref, j_ref, w1_ref, b1_ref, w2_ref, b2_ref, o_ref):
        # x = i_emb * j_emb   (f32 VPU mul; cast the product to bf16 for the MXU feed)
        x = (i_ref[...] * j_ref[...]).astype(jnp.bfloat16)                 # (T, E)
        w1 = w1_ref[...].astype(jnp.bfloat16)                              # (E, H)
        # h = relu(x @ W1^T + b1)        (MXU, f32 accumulation)
        h = jnp.dot(x, w1, preferred_element_type=jnp.float32)             # (T, H) f32
        h = jnp.maximum(h + b1_ref[...], 0.0)
        # TODO(synk): nn.Dropout(0.2) is identity at inference; a training-mode path
        #             would use pltpu.prng_seed + pltpu.stateful_bernoulli masking.
        # Second layer computed transposed so the edge/batch axis lands on lanes:
        #   y^T[o, t] = sum_h W2[o, h] * h[t, h]   (contract last dims, "trans_b")
        y_t = lax.dot_general(
            w2_ref[...].astype(jnp.bfloat16), h.astype(jnp.bfloat16),
            dimension_numbers=(((1,), (1,)), ((), ())),
            preferred_element_type=jnp.float32,
        )                                                                   # (O, T) f32
        if b2_in_smem:
            y_t = y_t + b2_ref[0]          # scalar bias from SMEM
        else:
            y_t = y_t + b2_ref[...]        # (O, 1) bias column from VMEM
        o_ref[...] = jax.nn.sigmoid(y_t).astype(o_ref.dtype)               # lane-dense
    return kernel


def _as_f32(x):
    return x if x.dtype == jnp.float32 else x.astype(jnp.float32)


def link_predictor_forward(i_emb, j_emb, w1_t, b1, w2, b2):
    """Fused LinkPredictor forward pass.

    i_emb, j_emb : [N, emb_feats] float32
    w1_t         : [emb_feats, hid_feats]   (== lin1.weight.T)
    b1           : [hid_feats]
    w2           : [out_feats, hid_feats]   (== lin2.weight, PyTorch layout)
    b2           : [out_feats]
    returns      : [N, out_feats] = sigmoid(lin2(relu(lin1(i_emb * j_emb))))
    """
    N, E = i_emb.shape
    H = w1_t.shape[1]
    O = w2.shape[0]

    num_tc = _num_tensorcores()
    tile = _choose_tile(N, E, num_tc)
    n_tiles = pl.cdiv(N, tile)

    i_f = _as_f32(i_emb)
    j_f = _as_f32(j_emb)
    w1_f = _as_f32(w1_t)
    b1_f = _as_f32(b1).reshape(1, H)
    w2_f = _as_f32(w2)

    b2_in_smem = (O == 1)
    if b2_in_smem:
        b2_arg = _as_f32(b2).reshape(O)
        b2_spec = pl.BlockSpec(memory_space=pltpu.MemorySpace.SMEM)
    else:
        b2_arg = _as_f32(b2).reshape(O, 1)
        b2_spec = pl.BlockSpec((O, 1), lambda i: (0, 0))

    cost = pl.CostEstimate(
        flops=2 * N * E * H + 2 * N * H * O + N * E,
        transcendentals=N * O,
        bytes_accessed=2 * N * E * 4 + N * O * 4 + (E * H + H + O * H + O) * 4,
    )

    out_t = pl.pallas_call(
        _make_kernel(b2_in_smem),
        out_shape=jax.ShapeDtypeStruct((O, N), jnp.float32),
        grid_spec=pltpu.PrefetchScalarGridSpec(
            num_scalar_prefetch=0,
            grid=(n_tiles,),
            in_specs=[
                pl.BlockSpec((tile, E), lambda i: (i, 0)),   # i_emb tile
                pl.BlockSpec((tile, E), lambda i: (i, 0)),   # j_emb tile
                pl.BlockSpec((E, H), lambda i: (0, 0)),      # W1^T (VMEM-resident)
                pl.BlockSpec((1, H), lambda i: (0, 0)),      # b1
                pl.BlockSpec((O, H), lambda i: (0, 0)),      # W2  (VMEM-resident)
                b2_spec,                                      # b2 (SMEM scalar if O==1)
            ],
            out_specs=pl.BlockSpec((O, tile), lambda i: (0, i)),   # lane-dense slab
        ),
        compiler_params=pltpu.CompilerParams(
            dimension_semantics=("parallel",),
            vmem_limit_bytes=32 * 1024 * 1024,
        ),
        cost_estimate=cost,
    )(i_f, j_f, w1_f, b1_f, w2_f, b2_arg)

    # (O, N) -> (N, O): tiny, layout plumbing only.
    return out_t.T


def _reference(i_emb, j_emb, w1_t, b1, w2, b2):
    x = i_emb * j_emb
    h = jnp.maximum(x @ w1_t + b1.reshape(1, -1), 0.0)
    return jax.nn.sigmoid(h @ w2.T + b2.reshape(1, -1))


if __name__ == "__main__":
    # Small shapes consistent with the module: N edges, emb/hid/out feature dims.
    N, EMB, HID, OUT = 1024, 32, 64, 1

    key = jax.random.PRNGKey(0)
    k_i, k_j, k_w1, k_b1, k_w2, k_b2 = jax.random.split(key, 6)

    i_emb = jax.random.normal(k_i, (N, EMB), dtype=jnp.float32)
    j_emb = jax.random.normal(k_j, (N, EMB), dtype=jnp.float32)

    # PyTorch nn.Linear parameter shapes: weight [out, in], bias [out].
    w1 = jax.random.normal(k_w1, (HID, EMB), dtype=jnp.float32) * (1.0 / jnp.sqrt(EMB))
    b1 = jax.random.normal(k_b1, (HID,), dtype=jnp.float32) * 0.01
    w2 = jax.random.normal(k_w2, (OUT, HID), dtype=jnp.float32) * (1.0 / jnp.sqrt(HID))
    b2 = jax.random.normal(k_b2, (OUT,), dtype=jnp.float32) * 0.01

    out = link_predictor_forward(i_emb, j_emb, w1.T, b1, w2, b2)
    out = jax.block_until_ready(out)
    assert out.shape == (N, OUT)

    ref = _reference(i_emb, j_emb, w1.T, b1, w2, b2)
    # Only the MXU feeds are bf16 (f32 accumulation); logits stay within ~1e-2.
    max_err = float(jnp.max(jnp.abs(out - ref)))
    assert max_err < 2e-2, f"mismatch vs reference: max abs err {max_err}"

    print("KERNEL_OK")
</pallas_src>

<mosaic_0001>
module attributes {stable_mosaic.version = 11 : i64} {
  func.func @kernel(%arg0: i32, %arg1: memref<1024x32xf32, #tpu.memory_space<vmem>>, %arg2: memref<1024x32xf32, #tpu.memory_space<vmem>>, %arg3: memref<32x64xf32, #tpu.memory_space<vmem>>, %arg4: memref<1x64xf32, #tpu.memory_space<vmem>>, %arg5: memref<1x64xf32, #tpu.memory_space<vmem>>, %arg6: memref<1xf32, #tpu.memory_space<smem>>, %arg7: memref<1x1024xf32, #tpu.memory_space<vmem>>) attributes {dimension_semantics = [#tpu.dimension_semantics<parallel>], iteration_bounds = array<i64: 1>, scalar_prefetch = 0 : i64, scratch_operands = 0 : i64, tpu.core_type = #tpu.core_type<tc>, window_params = [{transform_indices = @transform_0, window_bounds = array<i64: 1024, 32>}, {transform_indices = @transform_1, window_bounds = array<i64: 1024, 32>}, {pipeline_mode = #tpu.pipeline_mode<synchronous>, transform_indices = @transform_2, window_bounds = array<i64: 32, 64>}, {pipeline_mode = #tpu.pipeline_mode<synchronous>, transform_indices = @transform_3, window_bounds = array<i64: 1, 64>}, {pipeline_mode = #tpu.pipeline_mode<synchronous>, transform_indices = @transform_4, window_bounds = array<i64: 1, 64>}, {transform_indices = @transform_5, window_bounds = array<i64: 1>}, {transform_indices = @transform_6, window_bounds = array<i64: 1, 1024>}]} {
    %c0 = arith.constant 0 : index
    %c0_0 = arith.constant 0 : index
    %0 = vector.load %arg1[%c0, %c0_0] : memref<1024x32xf32, #tpu.memory_space<vmem>>, vector<1024x32xf32>
    %c0_1 = arith.constant 0 : index
    %c0_2 = arith.constant 0 : index
    %1 = vector.load %arg2[%c0_1, %c0_2] : memref<1024x32xf32, #tpu.memory_space<vmem>>, vector<1024x32xf32>
    %2 = arith.mulf %0, %1 : vector<1024x32xf32>
    %3 = arith.truncf %2 : vector<1024x32xf32> to vector<1024x32xbf16>
    %c0_3 = arith.constant 0 : index
    %c0_4 = arith.constant 0 : index
    %4 = vector.load %arg3[%c0_3, %c0_4] : memref<32x64xf32, #tpu.memory_space<vmem>>, vector<32x64xf32>
    %5 = arith.truncf %4 : vector<32x64xf32> to vector<32x64xbf16>
    %cst = arith.constant dense<0.000000e+00> : vector<1024x64xf32>
    %6 = tpu.matmul %3, %5, %cst {dimension_numbers = #tpu.dot_dimension_numbers<[1], [0], [0], [1], [0, 0, 1, 1], [], []>} : vector<1024x32xbf16>, vector<32x64xbf16>, vector<1024x64xf32> -> vector<1024x64xf32>
    %c0_5 = arith.constant 0 : index
    %c0_6 = arith.constant 0 : index
    %7 = vector.load %arg4[%c0_5, %c0_6] : memref<1x64xf32, #tpu.memory_space<vmem>>, vector<1x64xf32>
    %8 = vector.broadcast %7 : vector<1x64xf32> to vector<1024x64xf32>
    %9 = arith.addf %6, %8 : vector<1024x64xf32>
    %cst_7 = arith.constant 0.000000e+00 : f32
    %10 = vector.broadcast %cst_7 : f32 to vector<1024x64xf32>
    %11 = arith.maximumf %9, %10 : vector<1024x64xf32>
    %c0_8 = arith.constant 0 : index
    %c0_9 = arith.constant 0 : index
    %12 = vector.load %arg5[%c0_8, %c0_9] : memref<1x64xf32, #tpu.memory_space<vmem>>, vector<1x64xf32>
    %13 = arith.truncf %12 : vector<1x64xf32> to vector<1x64xbf16>
    %14 = arith.truncf %11 : vector<1024x64xf32> to vector<1024x64xbf16>
    %cst_10 = arith.constant dense<0.000000e+00> : vector<1x1024xf32>
    %15 = tpu.matmul %13, %14, %cst_10 {dimension_numbers = #tpu.dot_dimension_numbers<[1], [1], [0], [0], [0, 0, 1, 0], [], []>} : vector<1x64xbf16>, vector<1024x64xbf16>, vector<1x1024xf32> -> vector<1x1024xf32>
    %c0_11 = arith.constant 0 : index
    %16 = memref.load %arg6[%c0_11] : memref<1xf32, #tpu.memory_space<smem>>
    %17 = vector.broadcast %16 : f32 to vector<1x1024xf32>
    %18 = arith.addf %15, %17 : vector<1x1024xf32>
    %19 = arith.negf %18 : vector<1x1024xf32>
    %20 = math.exp %19 : vector<1x1024xf32>
    %cst_12 = arith.constant 1.000000e+00 : f32
    %21 = vector.broadcast %cst_12 : f32 to vector<1x1024xf32>
    %22 = arith.addf %21, %20 : vector<1x1024xf32>
    %23 = arith.divf %21, %22 : vector<1x1024xf32>
    %c0_13 = arith.constant 0 : index
    %c0_14 = arith.constant 0 : index
    %24 = vector.load %arg7[%c0_13, %c0_14] : memref<1x1024xf32, #tpu.memory_space<vmem>>, vector<1x1024xf32>
    tpu.vector_store %arg7[%c0_13, %c0_14], %23 {strides = array<i32>} : memref<1x1024xf32, #tpu.memory_space<vmem>>, vector<1x1024xf32>,
    return
  }
  func.func @transform_0(%arg0: i32) -> (i32, i32) {
    %c0_i32 = arith.constant 0 : i32
    %c0_i32_0 = arith.constant 0 : i32
    return %arg0, %c0_i32 : i32, i32
  }
  func.func @transform_1(%arg0: i32) -> (i32, i32) {
    %c0_i32 = arith.constant 0 : i32
    %c0_i32_0 = arith.constant 0 : i32
    return %arg0, %c0_i32 : i32, i32
  }
  func.func @transform_2(%arg0: i32) -> (i32, i32) {
    %c0_i32 = arith.constant 0 : i32
    %c0_i32_0 = arith.constant 0 : i32
    %c0_i32_1 = arith.constant 0 : i32
    return %c0_i32, %c0_i32_0 : i32, i32
  }
  func.func @transform_3(%arg0: i32) -> (i32, i32) {
    %c0_i32 = arith.constant 0 : i32
    %c0_i32_0 = arith.constant 0 : i32
    %c0_i32_1 = arith.constant 0 : i32
    return %c0_i32, %c0_i32_0 : i32, i32
  }
  func.func @transform_4(%arg0: i32) -> (i32, i32) {
    %c0_i32 = arith.constant 0 : i32
    %c0_i32_0 = arith.constant 0 : i32
    %c0_i32_1 = arith.constant 0 : i32
    return %c0_i32, %c0_i32_0 : i32, i32
  }
  func.func @transform_5(%arg0: i32) -> i32 {
    %c0_i32 = arith.constant 0 : i32
    %c0_i32_0 = arith.constant 0 : i32
    return %c0_i32 : i32
  }
  func.func @transform_6(%arg0: i32) -> (i32, i32) {
    %c0_i32 = arith.constant 0 : i32
    %c0_i32_0 = arith.constant 0 : i32
    return %c0_i32, %arg0 : i32, i32
  }
}

</mosaic_0001>

<bundles_post_ra>
// kernel: tpu_custom_call.1
= control target key start
LH: loop header
LB: loop body
LE: loop exit
PB: predicated region body
PF: predicated region fallthrough
CT: control target
= control target key end

     0   :  { %vm487_vm0 = vcmask 261120   ;;  %s3574_s0 = inlined_call_operand.vmem [shape: f32[1024,32], index: 0, kind: input, shape index: {}]   ;;  %s3575_s1 = inlined_call_operand.vmem [shape: f32[1024,32], index: 1, kind: input, shape index: {}]   ;;  %s3576_s2 = inlined_call_operand.vmem [shape: f32[32,64], index: 2, kind: input, shape index: {}]   ;;  %s3577_s3 = inlined_call_operand.vmem [shape: f32[1,64], index: 3, kind: input, shape index: {}]   ;;  %s3578_s4 = inlined_call_operand.vmem [shape: f32[1,64], index: 4, kind: input, shape index: {}]   ;;  %s3579_s5 = inlined_call_operand.<no memory space> [shape: f32[1], index: 5, kind: input, shape index: {}]   ;;  %s3580_s6 = inlined_call_operand.hbm [shape: f32[1,1024], index: 6, kind: output, shape index: {}]  }
   0x1   :  { %v474_v0 = vld [vmem:[%s3576_s2] sm:$0xff]  ;;  %v475_v1 = vld [vmem:[%s3576_s2 + $0x8] sm:$0xff]  ;;  %v476_v2 = vld [vmem:[%s3576_s2 + $0x10] sm:$0xff] }
   0x2   :  { %v478_v3 = vpack.c.bf16 %v475_v1, %v474_v0  ;;  %v477_v4 = vld [vmem:[%s3576_s2 + $0x18] sm:$0xff]  ;;  %v26_v5 = vld [vmem:[%s3574_s0] sm:$0xff]  ;;  %v27_v6 = vld [vmem:[%s3574_s0 + $0x8] sm:$0xff] }
   0x3   :  { %v479_v7 = vpack.c.bf16 %v477_v4, %v476_v2  ;;  %v154_v8 = vld [vmem:[%s3575_s1] sm:$0xff]  ;;  %v155_v9 = vld [vmem:[%s3575_s1 + $0x8] sm:$0xff]  ;;  %v28_v10 = vld [vmem:[%s3574_s0 + $0x10] sm:$0xff] }
   0x4   :  { %2117 = vmatprep.subr.bf16.mxu0 %v478_v3  ;;  %v282_v11 = vmul.f32 %v154_v8, %v26_v5  ;;  %v283_v12 = vmul.f32 %v155_v9, %v27_v6  ;;  %v29_v13 = vld [vmem:[%s3574_s0 + $0x18] sm:$0xff]  ;;  %v156_v14 = vld [vmem:[%s3575_s1 + $0x10] sm:$0xff]  ;;  %v30_v18 = vld [vmem:[%s3574_s0 + $0x20] sm:$0xff] }
   0x5   :  { %v157_v15 = vld [vmem:[%s3575_s1 + $0x18] sm:$0xff]  ;;  %2118 = vmatpush3.bf16.msra.mxu0 %v478_v3  ;;  %v284_v16 = vmul.f32 %v156_v14, %v28_v10  ;;  %v31_v19 = vld [vmem:[%s3574_s0 + $0x28] sm:$0xff]  ;;  %v158_v20 = vld [vmem:[%s3575_s1 + $0x20] sm:$0xff] }
   0x6   :  { %v285_v17 = vmul.f32 %v157_v15, %v29_v13  ;;  %2119 = vmatprep.subr.bf16.mxu0 %v479_v7  ;;  %v410_v21 = vpack.c.bf16 %v283_v12, %v282_v11  ;;  %v159_v22 = vld [vmem:[%s3575_s1 + $0x28] sm:$0xff]  ;;  %v286_v23 = vmul.f32 %v158_v20, %v30_v18  ;;  %v32_v26 = vld [vmem:[%s3574_s0 + $0x30] sm:$0xff]  ;;  %v33_v27 = vld [vmem:[%s3574_s0 + $0x38] sm:$0xff] }
   0x7   :  { %v287_v24 = vmul.f32 %v159_v22, %v31_v19  ;;  %v160_v29 = vld [vmem:[%s3575_s1 + $0x30] sm:$0xff]  ;;  %v161_v30 = vld [vmem:[%s3575_s1 + $0x38] sm:$0xff]  ;;  %v34_v31 = vld [vmem:[%s3574_s0 + $0x40] sm:$0xff] }
   0x8   :  { %2121 = vmatprep.mubr.msk.bf16.mxu0 %vm487_vm0, %v410_v21  ;;  %v411_v25 = vpack.c.bf16 %v285_v17, %v284_v16  ;;  %v35_v32 = vld [vmem:[%s3574_s0 + $0x48] sm:$0xff]  ;;  %v162_v33 = vld [vmem:[%s3575_s1 + $0x40] sm:$0xff]  ;;  %v288_v35 = vmul.f32 %v160_v29, %v32_v26  ;;  %v289_v36 = vmul.f32 %v161_v30, %v33_v27  ;;  %v36_v40 = vld [vmem:[%s3574_s0 + $0x50] sm:$0xff] }
   0x9   :  { %2120 = vmatpush3.bf16.msra.mxu0 %v479_v7  ;;  %v412_v28 = vpack.c.bf16 %v287_v24, %v286_v23  ;;  %v163_v34 = vld [vmem:[%s3575_s1 + $0x48] sm:$0xff]  ;;  %v290_v37 = vmul.f32 %v162_v33, %v34_v31  ;;  %v37_v41 = vld [vmem:[%s3574_s0 + $0x58] sm:$0xff]  ;;  %v164_v43 = vld [vmem:[%s3575_s1 + $0x50] sm:$0xff] }
   0xa   :  { %v291_v38 = vmul.f32 %v163_v34, %v35_v32  ;;  %v413_v39 = vpack.c.bf16 %v289_v36, %v288_v35  ;;  %v165_v44 = vld [vmem:[%s3575_s1 + $0x58] sm:$0xff]  ;;  %v38_v45 = vld [vmem:[%s3574_s0 + $0x60] sm:$0xff]  ;;  %v39_v46 = vld [vmem:[%s3574_s0 + $0x68] sm:$0xff]  ;;  %v292_v49 = vmul.f32 %v164_v43, %v36_v40 }
   0xb   :  { %v166_v47 = vld [vmem:[%s3575_s1 + $0x60] sm:$0xff]  ;;  %v167_v48 = vld [vmem:[%s3575_s1 + $0x68] sm:$0xff]  ;;  %v293_v50 = vmul.f32 %v165_v44, %v37_v41  ;;  %v40_v54 = vld [vmem:[%s3574_s0 + $0x70] sm:$0xff] }
   0xc   :  { %2122 = vmatmul.mubr.msk.bf16.vlgmr.msra.gmra.mrb[0].mxu0 %vm487_vm0, %v411_v25  ;;  %v414_v42 = vpack.c.bf16 %v291_v38, %v290_v37  ;;  %v294_v51 = vmul.f32 %v166_v47, %v38_v45  ;;  %v295_v52 = vmul.f32 %v167_v48, %v39_v46  ;;  %v41_v55 = vld [vmem:[%s3574_s0 + $0x78] sm:$0xff]  ;;  %v168_v57 = vld [vmem:[%s3575_s1 + $0x70] sm:$0xff]  ;;  %v42_v59 = vld [vmem:[%s3574_s0 + $0x80] sm:$0xff] }
   0xd   :  { %2125 = vmatprep.mubr.msk.bf16.mxu0 %vm487_vm0, %v412_v28  ;;  %v415_v53 = vpack.c.bf16 %v293_v50, %v292_v49  ;;  %v169_v58 = vld [vmem:[%s3575_s1 + $0x78] sm:$0xff]  ;;  %v43_v60 = vld [vmem:[%s3574_s0 + $0x88] sm:$0xff]  ;;  %v170_v61 = vld [vmem:[%s3575_s1 + $0x80] sm:$0xff]  ;;  %v296_v63 = vmul.f32 %v168_v57, %v40_v54 }
   0xe   :  { %v416_v56 = vpack.c.bf16 %v295_v52, %v294_v51  ;;  %v171_v62 = vld [vmem:[%s3575_s1 + $0x88] sm:$0xff]  ;;  %v297_v0 = vmul.f32 %v169_v58, %v41_v55  ;;  %v298_v1 = vmul.f32 %v170_v61, %v42_v59  ;;  %v44_v4 = vld [vmem:[%s3574_s0 + $0x90] sm:$0xff]  ;;  %v45_v5 = vld [vmem:[%s3574_s0 + $0x98] sm:$0xff] }
   0xf   :  { %v299_v2 = vmul.f32 %v171_v62, %v43_v60  ;;  %v172_v7 = vld [vmem:[%s3575_s1 + $0x90] sm:$0xff]  ;;  %v173_v8 = vld [vmem:[%s3575_s1 + $0x98] sm:$0xff]  ;;  %v46_v9 = vld [vmem:[%s3574_s0 + $0xa0] sm:$0xff] }
  0x10   :  { %v417_v3 = vpack.c.bf16 %v297_v0, %v296_v63  ;;  %v47_v10 = vld [vmem:[%s3574_s0 + $0xa8] sm:$0xff]  ;;  %v174_v11 = vld [vmem:[%s3575_s1 + $0xa0] sm:$0xff]  ;;  %v300_v13 = vmul.f32 %v172_v7, %v44_v4  ;;  %v301_v14 = vmul.f32 %v173_v8, %v45_v5  ;;  %v48_v18 = vld [vmem:[%s3574_s0 + $0xb0] sm:$0xff] }
  0x11   :  { %v418_v6 = vpack.c.bf16 %v299_v2, %v298_v1  ;;  %v175_v12 = vld [vmem:[%s3575_s1 + $0xa8] sm:$0xff]  ;;  %v302_v15 = vmul.f32 %v174_v11, %v46_v9  ;;  %v49_v19 = vld [vmem:[%s3574_s0 + $0xb8] sm:$0xff]  ;;  %v176_v21 = vld [vmem:[%s3575_s1 + $0xb0] sm:$0xff] }
  0x12   :  { %v303_v16 = vmul.f32 %v175_v12, %v47_v10  ;;  %v419_v17 = vpack.c.bf16 %v301_v14, %v300_v13  ;;  %v177_v22 = vld [vmem:[%s3575_s1 + $0xb8] sm:$0xff]  ;;  %v50_v23 = vld [vmem:[%s3574_s0 + $0xc0] sm:$0xff]  ;;  %v51_v24 = vld [vmem:[%s3574_s0 + $0xc8] sm:$0xff]  ;;  %v304_v27 = vmul.f32 %v176_v21, %v48_v18 }
  0x13   :  { %v178_v25 = vld [vmem:[%s3575_s1 + $0xc0] sm:$0xff]  ;;  %v179_v26 = vld [vmem:[%s3575_s1 + $0xc8] sm:$0xff]  ;;  %v305_v28 = vmul.f32 %v177_v22, %v49_v19  ;;  %v52_v32 = vld [vmem:[%s3574_s0 + $0xd0] sm:$0xff] }
  0x14   :  { %2126 = vmatmul.mubr.msk.bf16.gmra.mrb[4].mxu0 %vm487_vm0, %v413_v39  ;;  %v420_v20 = vpack.c.bf16 %v303_v16, %v302_v15  ;;  %v306_v29 = vmul.f32 %v178_v25, %v50_v23  ;;  %v307_v30 = vmul.f32 %v179_v26, %v51_v24  ;;  %v53_v33 = vld [vmem:[%s3574_s0 + $0xd8] sm:$0xff]  ;;  %v180_v35 = vld [vmem:[%s3575_s1 + $0xd0] sm:$0xff]  ;;  %v54_v37 = vld [vmem:[%s3574_s0 + $0xe0] sm:$0xff] }
  0x15   :  { %2129 = vmatprep.mubr.msk.bf16.mxu0 %vm487_vm0, %v414_v42  ;;  %v421_v31 = vpack.c.bf16 %v305_v28, %v304_v27  ;;  %v181_v36 = vld [vmem:[%s3575_s1 + $0xd8] sm:$0xff]  ;;  %v55_v38 = vld [vmem:[%s3574_s0 + $0xe8] sm:$0xff]  ;;  %v182_v39 = vld [vmem:[%s3575_s1 + $0xe0] sm:$0xff]  ;;  %v308_v41 = vmul.f32 %v180_v35, %v52_v32 }
  0x16   :  { %v422_v34 = vpack.c.bf16 %v307_v30, %v306_v29  ;;  %v183_v40 = vld [vmem:[%s3575_s1 + $0xe8] sm:$0xff]  ;;  %v309_v42 = vmul.f32 %v181_v36, %v53_v33  ;;  %v310_v43 = vmul.f32 %v182_v39, %v54_v37  ;;  %v56_v46 = vld [vmem:[%s3574_s0 + $0xf0] sm:$0xff]  ;;  %v57_v47 = vld [vmem:[%s3574_s0 + $0xf8] sm:$0xff] }
  0x17   :  { %v311_v44 = vmul.f32 %v183_v40, %v55_v38  ;;  %v184_v49 = vld [vmem:[%s3575_s1 + $0xf0] sm:$0xff]  ;;  %v185_v50 = vld [vmem:[%s3575_s1 + $0xf8] sm:$0xff]  ;;  %v58_v51 = vld [vmem:[%s3574_s0 + $0x100] sm:$0xff] }
  0x18   :  { %v423_v45 = vpack.c.bf16 %v309_v42, %v308_v41  ;;  %v59_v52 = vld [vmem:[%s3574_s0 + $0x108] sm:$0xff]  ;;  %v312_v55 = vmul.f32 %v184_v49, %v56_v46  ;;  %v60_v60 = vld [vmem:[%s3574_s0 + $0x110] sm:$0xff]  ;;  %v61_v61 = vld [vmem:[%s3574_s0 + $0x118] sm:$0xff] }
  0x19   :  { %v424_v48 = vpack.c.bf16 %v311_v44, %v310_v43  ;;  %v187_v54 = vld [vmem:[%s3575_s1 + $0x108] sm:$0xff]  ;;  %v188_v62 = vld [vmem:[%s3575_s1 + $0x110] sm:$0xff]  ;;  %v189_v0 = vld [vmem:[%s3575_s1 + $0x118] sm:$0xff] }
  0x1a   :  { %v315_v58 = vmul.f32 %v187_v54, %v59_v52  ;;  %v62_v1 = vld [vmem:[%s3574_s0 + $0x120] sm:$0xff]  ;;  %v63_v2 = vld [vmem:[%s3574_s0 + $0x128] sm:$0xff] }
  0x1b   :  { %v191_v4 = vld [vmem:[%s3575_s1 + $0x128] sm:$0xff] }
  0x1c   :  { %2130 = vmatmul.mubr.msk.bf16.gmra.mrb[8].mxu0 %vm487_vm0, %v415_v53  ;;  %v186_v53 = vld [vmem:[%s3575_s1 + $0x100] sm:$0xff] }
  0x1d   :  { %2133 = vmatprep.mubr.msk.bf16.mxu0 %vm487_vm0, %v416_v56  ;;  %v313_v56 = vmul.f32 %v185_v50, %v57_v47  ;;  %v314_v57 = vmul.f32 %v186_v53, %v58_v51 }
  0x1f   :  { %v425_v59 = vpack.c.bf16 %v313_v56, %v312_v55  ;;  %v426_v63 = vpack.c.bf16 %v315_v58, %v314_v57 }
  0x24   :  { %2134 = vmatmul.mubr.msk.bf16.gmra.mrb[12].mxu0 %vm487_vm0, %v417_v3  ;;  %v190_v3 = vld [vmem:[%s3575_s1 + $0x120] sm:$0xff] }
  0x25   :  { %2137 = vmatprep.mubr.msk.bf16.mxu0 %vm487_vm0, %v418_v6 }
  0x2c   :  { %2138 = vmatmul.mubr.msk.bf16.gmra.mrb[16].mxu0 %vm487_vm0, %v419_v17 }
  0x2d   :  { %2141 = vmatprep.mubr.msk.bf16.mxu0 %vm487_vm0, %v420_v20 }
  0x34   :  { %2142 = vmatmul.mubr.msk.bf16.gmra.mrb[20].mxu0 %vm487_vm0, %v421_v31 }
  0x35   :  { %2145 = vmatprep.mubr.msk.bf16.mxu0 %vm487_vm0, %v422_v34 }
  0x3c   :  { %2146 = vmatmul.mubr.msk.bf16.gmra.mrb[24].mxu0 %vm487_vm0, %v423_v45 }
  0x3d   :  { %2149 = vmatprep.mubr.msk.bf16.mxu0 %vm487_vm0, %v424_v48 }
  0x3e   :  { %12 = vsyncpa [#allocation4], 0  ;;  %v316_v5 = vmul.f32 %v188_v62, %v60_v60  ;;  %v317_v6 = vmul.f32 %v189_v0, %v61_v61  ;;  %v318_v7 = vmul.f32 %v190_v3, %v62_v1  ;;  %v319_v8 = vmul.f32 %v191_v4, %v63_v2  ;;  %v64_v10 = vld [vmem:[%s3574_s0 + $0x130] sm:$0xff]  ;;  %v65_v11 = vld [vmem:[%s3574_s0 + $0x138] sm:$0xff] }
  0x3f   :  { %v192_v13 = vld [vmem:[%s3575_s1 + $0x130] sm:$0xff]  ;;  %v193_v14 = vld [vmem:[%s3575_s1 + $0x138] sm:$0xff]  ;;  %v66_v15 = vld [vmem:[%s3574_s0 + $0x140] sm:$0xff]  ;;  %vm1421_vm1 = vcmask 523264  }
  0x40   :  { %v427_v9 = vpack.c.bf16 %v317_v6, %v316_v5  ;;  %v428_v12 = vpack.c.bf16 %v319_v8, %v318_v7  ;;  %v67_v16 = vld [vmem:[%s3574_s0 + $0x148] sm:$0xff]  ;;  %v194_v17 = vld [vmem:[%s3575_s1 + $0x140] sm:$0xff]  ;;  %v320_v19 = vmul.f32 %v192_v13, %v64_v10  ;;  %v321_v20 = vmul.f32 %v193_v14, %v65_v11  ;;  %v68_v24 = vld [vmem:[%s3574_s0 + $0x150] sm:$0xff] }
  0x41   :  { %v195_v18 = vld [vmem:[%s3575_s1 + $0x148] sm:$0xff]  ;;  %v322_v21 = vmul.f32 %v194_v17, %v66_v15  ;;  %v69_v25 = vld [vmem:[%s3574_s0 + $0x158] sm:$0xff]  ;;  %v196_v27 = vld [vmem:[%s3575_s1 + $0x150] sm:$0xff] }
  0x42   :  { %v323_v22 = vmul.f32 %v195_v18, %v67_v16  ;;  %v429_v23 = vpack.c.bf16 %v321_v20, %v320_v19  ;;  %v197_v28 = vld [vmem:[%s3575_s1 + $0x158] sm:$0xff]  ;;  %v70_v29 = vld [vmem:[%s3574_s0 + $0x160] sm:$0xff]  ;;  %v71_v30 = vld [vmem:[%s3574_s0 + $0x168] sm:$0xff]  ;;  %v324_v33 = vmul.f32 %v196_v27, %v68_v24 }
  0x43   :  { %v198_v31 = vld [vmem:[%s3575_s1 + $0x160] sm:$0xff]  ;;  %v199_v32 = vld [vmem:[%s3575_s1 + $0x168] sm:$0xff]  ;;  %v325_v34 = vmul.f32 %v197_v28, %v69_v25  ;;  %v72_v38 = vld [vmem:[%s3574_s0 + $0x170] sm:$0xff] }
  0x44   :  { %2150 = vmatmul.mubr.msk.bf16.gmra.mrb[28].mxu0 %vm487_vm0, %v425_v59  ;;  %v430_v26 = vpack.c.bf16 %v323_v22, %v322_v21  ;;  %v326_v35 = vmul.f32 %v198_v31, %v70_v29  ;;  %v327_v36 = vmul.f32 %v199_v32, %v71_v30  ;;  %v73_v39 = vld [vmem:[%s3574_s0 + $0x178] sm:$0xff]  ;;  %v200_v41 = vld [vmem:[%s3575_s1 + $0x170] sm:$0xff]  ;;  %v74_v43 = vld [vmem:[%s3574_s0 + $0x180] sm:$0xff] }
  0x45   :  { %2153 = vmatprep.mubr.msk.bf16.mxu0 %vm487_vm0, %v426_v63  ;;  %v431_v37 = vpack.c.bf16 %v325_v34, %v324_v33  ;;  %v201_v42 = vld [vmem:[%s3575_s1 + $0x178] sm:$0xff]  ;;  %v75_v44 = vld [vmem:[%s3574_s0 + $0x188] sm:$0xff]  ;;  %v202_v45 = vld [vmem:[%s3575_s1 + $0x180] sm:$0xff]  ;;  %v328_v47 = vmul.f32 %v200_v41, %v72_v38 }
  0x46   :  { %v432_v40 = vpack.c.bf16 %v327_v36, %v326_v35  ;;  %v203_v46 = vld [vmem:[%s3575_s1 + $0x188] sm:$0xff]  ;;  %v329_v48 = vmul.f32 %v201_v42, %v73_v39  ;;  %v330_v49 = vmul.f32 %v202_v45, %v74_v43  ;;  %v76_v52 = vld [vmem:[%s3574_s0 + $0x190] sm:$0xff]  ;;  %v77_v53 = vld [vmem:[%s3574_s0 + $0x198] sm:$0xff] }
  0x47   :  { %v331_v50 = vmul.f32 %v203_v46, %v75_v44  ;;  %v204_v55 = vld [vmem:[%s3575_s1 + $0x190] sm:$0xff]  ;;  %v205_v56 = vld [vmem:[%s3575_s1 + $0x198] sm:$0xff]  ;;  %v78_v57 = vld [vmem:[%s3574_s0 + $0x1a0] sm:$0xff] }
  0x48   :  { %v433_v51 = vpack.c.bf16 %v329_v48, %v328_v47  ;;  %v79_v58 = vld [vmem:[%s3574_s0 + $0x1a8] sm:$0xff]  ;;  %v206_v59 = vld [vmem:[%s3575_s1 + $0x1a0] sm:$0xff]  ;;  %v332_v61 = vmul.f32 %v204_v55, %v76_v52  ;;  %v333_v62 = vmul.f32 %v205_v56, %v77_v53  ;;  %v80_v2 = vld [vmem:[%s3574_s0 + $0x1b0] sm:$0xff] }
  0x49   :  { %v434_v54 = vpack.c.bf16 %v331_v50, %v330_v49  ;;  %v207_v60 = vld [vmem:[%s3575_s1 + $0x1a8] sm:$0xff]  ;;  %v334_v63 = vmul.f32 %v206_v59, %v78_v57  ;;  %v81_v3 = vld [vmem:[%s3574_s0 + $0x1b8] sm:$0xff]  ;;  %v208_v5 = vld [vmem:[%s3575_s1 + $0x1b0] sm:$0xff] }
  0x4a   :  { %v335_v0 = vmul.f32 %v207_v60, %v79_v58  ;;  %v435_v1 = vpack.c.bf16 %v333_v62, %v332_v61  ;;  %v209_v6 = vld [vmem:[%s3575_s1 + $0x1b8] sm:$0xff]  ;;  %v82_v7 = vld [vmem:[%s3574_s0 + $0x1c0] sm:$0xff]  ;;  %v83_v8 = vld [vmem:[%s3574_s0 + $0x1c8] sm:$0xff]  ;;  %v336_v11 = vmul.f32 %v208_v5, %v80_v2 }
  0x4b   :  { %v211_v10 = vld [vmem:[%s3575_s1 + $0x1c8] sm:$0xff]  ;;  %v84_v16 = vld [vmem:[%s3574_s0 + $0x1d0] sm:$0xff]  ;;  %v85_v17 = vld [vmem:[%s3574_s0 + $0x1d8] sm:$0xff] }
  0x4c   :  { %2154 = vmatmul.mubr.msk.bf16.gmra.mrb[32].mxu0 %vm487_vm0, %v427_v9  ;;  %v436_v4 = vpack.c.bf16 %v335_v0, %v334_v63  ;;  %v210_v9 = vld [vmem:[%s3575_s1 + $0x1c0] sm:$0xff]  ;;  %v339_v14 = vmul.f32 %v211_v10, %v83_v8  ;;  %v212_v19 = vld [vmem:[%s3575_s1 + $0x1d0] sm:$0xff]  ;;  %v213_v20 = vld [vmem:[%s3575_s1 + $0x1d8] sm:$0xff] }
  0x4d   :  { %2157 = vmatprep.mubr.msk.bf16.mxu0 %vm487_vm0, %v428_v12  ;;  %v337_v12 = vmul.f32 %v209_v6, %v81_v3  ;;  %v338_v13 = vmul.f32 %v210_v9, %v82_v7  ;;  %v86_v21 = vld [vmem:[%s3574_s0 + $0x1e0] sm:$0xff]  ;;  %v87_v22 = vld [vmem:[%s3574_s0 + $0x1e8] sm:$0xff]  ;;  %v340_v25 = vmul.f32 %v212_v19, %v84_v16  ;;  %v88_v30 = vld [vmem:[%s3574_s0 + $0x1f0] sm:$0xff] }
  0x4e   :  { %v215_v24 = vld [vmem:[%s3575_s1 + $0x1e8] sm:$0xff]  ;;  %v89_v31 = vld [vmem:[%s3574_s0 + $0x1f8] sm:$0xff]  ;;  %v216_v33 = vld [vmem:[%s3575_s1 + $0x1f0] sm:$0xff] }
  0x4f   :  { %v437_v15 = vpack.c.bf16 %v337_v12, %v336_v11  ;;  %v438_v18 = vpack.c.bf16 %v339_v14, %v338_v13  ;;  %v343_v28 = vmul.f32 %v215_v24, %v87_v22  ;;  %v217_v34 = vld [vmem:[%s3575_s1 + $0x1f8] sm:$0xff]  ;;  %v90_v35 = vld [vmem:[%s3574_s0 + $0x200] sm:$0xff]  ;;  %v91_v36 = vld [vmem:[%s3574_s0 + $0x208] sm:$0xff]  ;;  %v344_v39 = vmul.f32 %v216_v33, %v88_v30 }
  0x50   :  { %v219_v38 = vld [vmem:[%s3575_s1 + $0x208] sm:$0xff]  ;;  %v92_v44 = vld [vmem:[%s3574_s0 + $0x210] sm:$0xff]  ;;  %v93_v45 = vld [vmem:[%s3574_s0 + $0x218] sm:$0xff] }
  0x51   :  { %v347_v42 = vmul.f32 %v219_v38, %v91_v36  ;;  %v220_v47 = vld [vmem:[%s3575_s1 + $0x210] sm:$0xff]  ;;  %v221_v48 = vld [vmem:[%s3575_s1 + $0x218] sm:$0xff]  ;;  %v94_v49 = vld [vmem:[%s3574_s0 + $0x220] sm:$0xff] }
  0x52   :  { %v95_v50 = vld [vmem:[%s3574_s0 + $0x228] sm:$0xff]  ;;  %v348_v53 = vmul.f32 %v220_v47, %v92_v44  ;;  %v96_v58 = vld [vmem:[%s3574_s0 + $0x230] sm:$0xff]  ;;  %v97_v59 = vld [vmem:[%s3574_s0 + $0x238] sm:$0xff] }
  0x53   :  { %v223_v52 = vld [vmem:[%s3575_s1 + $0x228] sm:$0xff]  ;;  %v224_v61 = vld [vmem:[%s3575_s1 + $0x230] sm:$0xff]  ;;  %v225_v62 = vld [vmem:[%s3575_s1 + $0x238] sm:$0xff] }
  0x54   :  { %2158 = vmatmul.mubr.msk.bf16.gmra.mrb[36].mxu0 %vm487_vm0, %v429_v23  ;;  %v214_v23 = vld [vmem:[%s3575_s1 + $0x1e0] sm:$0xff]  ;;  %v351_v56 = vmul.f32 %v223_v52, %v95_v50  ;;  %v99_v0 = vld [vmem:[%s3574_s0 + $0x248] sm:$0xff]  ;;  %v352_v3 = vmul.f32 %v224_v61, %v96_v58  ;;  %v100_v8 = vld [vmem:[%s3574_s0 + $0x250] sm:$0xff] }
  0x55   :  { %2161 = vmatprep.mubr.msk.bf16.mxu0 %vm487_vm0, %v430_v26  ;;  %v341_v26 = vmul.f32 %v213_v20, %v85_v17  ;;  %v342_v27 = vmul.f32 %v214_v23, %v86_v21  ;;  %v98_v63 = vld [vmem:[%s3574_s0 + $0x240] sm:$0xff]  ;;  %v227_v2 = vld [vmem:[%s3575_s1 + $0x248] sm:$0xff]  ;;  %v101_v9 = vld [vmem:[%s3574_s0 + $0x258] sm:$0xff] }
  0x56   :  { %v355_v6 = vmul.f32 %v227_v2, %v99_v0  ;;  %v228_v11 = vld [vmem:[%s3575_s1 + $0x250] sm:$0xff]  ;;  %v229_v12 = vld [vmem:[%s3575_s1 + $0x258] sm:$0xff]  ;;  %v102_v13 = vld [vmem:[%s3574_s0 + $0x260] sm:$0xff] }
  0x57   :  { %v439_v29 = vpack.c.bf16 %v341_v26, %v340_v25  ;;  %v440_v32 = vpack.c.bf16 %v343_v28, %v342_v27  ;;  %v103_v14 = vld [vmem:[%s3574_s0 + $0x268] sm:$0xff]  ;;  %v356_v17 = vmul.f32 %v228_v11, %v100_v8  ;;  %v104_v22 = vld [vmem:[%s3574_s0 + $0x270] sm:$0xff]  ;;  %v105_v23 = vld [vmem:[%s3574_s0 + $0x278] sm:$0xff] }
  0x58   :  { %v231_v16 = vld [vmem:[%s3575_s1 + $0x268] sm:$0xff]  ;;  %v232_v25 = vld [vmem:[%s3575_s1 + $0x270] sm:$0xff]  ;;  %v233_v26 = vld [vmem:[%s3575_s1 + $0x278] sm:$0xff] }
  0x59   :  { %v359_v20 = vmul.f32 %v231_v16, %v103_v14  ;;  %v106_v27 = vld [vmem:[%s3574_s0 + $0x280] sm:$0xff]  ;;  %v107_v28 = vld [vmem:[%s3574_s0 + $0x288] sm:$0xff]  ;;  %v108_v36 = vld [vmem:[%s3574_s0 + $0x290] sm:$0xff] }
  0x5a   :  { %v235_v30 = vld [vmem:[%s3575_s1 + $0x288] sm:$0xff]  ;;  %v112_v50 = vld [vmem:[%s3574_s0 + $0x2b0] sm:$0xff] }
  0x5b   :  { %v239_v44 = vld [vmem:[%s3575_s1 + $0x2a8] sm:$0xff]  ;;  %v116_v0 = vld [vmem:[%s3574_s0 + $0x2d0] sm:$0xff] }
  0x5c   :  { %2162 = vmatmul.mubr.msk.bf16.gmra.mrb[40].mxu0 %vm487_vm0, %v431_v37  ;;  %v218_v37 = vld [vmem:[%s3575_s1 + $0x200] sm:$0xff]  ;;  %v243_v58 = vld [vmem:[%s3575_s1 + $0x2c8] sm:$0xff]  ;;  %v120_v14 = vld [vmem:[%s3574_s0 + $0x2f0] sm:$0xff] }
  0x5d   :  { %2165 = vmatprep.mubr.msk.bf16.mxu0 %vm487_vm0, %v432_v40  ;;  %v345_v40 = vmul.f32 %v217_v34, %v89_v31  ;;  %v346_v41 = vmul.f32 %v218_v37, %v90_v35  ;;  %v360_v31 = vmul.f32 %v232_v25, %v104_v22  ;;  %v363_v34 = vmul.f32 %v235_v30, %v107_v28  ;;  %v109_v37 = vld [vmem:[%s3574_s0 + $0x298] sm:$0xff]  ;;  %v247_v8 = vld [vmem:[%s3575_s1 + $0x2e8] sm:$0xff]  ;;  %v124_v28 = vld [vmem:[%s3574_s0 + $0x310] sm:$0xff] }
  0x5e   :  { %v251_v22 = vld [vmem:[%s3575_s1 + $0x308] sm:$0xff] }
  0x5f   :  { %v441_v43 = vpack.c.bf16 %v345_v40, %v344_v39  ;;  %v442_v46 = vpack.c.bf16 %v347_v42, %v346_v41  ;;  %v236_v39 = vld [vmem:[%s3575_s1 + $0x290] sm:$0xff]  ;;  %v237_v40 = vld [vmem:[%s3575_s1 + $0x298] sm:$0xff]  ;;  %v110_v41 = vld [vmem:[%s3574_s0 + $0x2a0] sm:$0xff] }
  0x60   :  { %v111_v42 = vld [vmem:[%s3574_s0 + $0x2a8] sm:$0xff] }
  0x64   :  { %2166 = vmatmul.mubr.msk.bf16.gmra.mrb[44].mxu0 %vm487_vm0, %v433_v51  ;;  %v222_v51 = vld [vmem:[%s3575_s1 + $0x220] sm:$0xff] }
  0x65   :  { %2169 = vmatprep.mubr.msk.bf16.mxu0 %vm487_vm0, %v434_v54  ;;  %v349_v54 = vmul.f32 %v221_v48, %v93_v45  ;;  %v350_v55 = vmul.f32 %v222_v51, %v94_v49  ;;  %v364_v45 = vmul.f32 %v236_v39, %v108_v36  ;;  %v367_v48 = vmul.f32 %v239_v44, %v111_v42  ;;  %v113_v51 = vld [vmem:[%s3574_s0 + $0x2b8] sm:$0xff]  ;;  %v255_v36 = vld [vmem:[%s3575_s1 + $0x328] sm:$0xff]  ;;  %v128_v44 = vld [vmem:[%s3574_s0 + $0x330] sm:$0xff] }
  0x67   :  { %v443_v57 = vpack.c.bf16 %v349_v54, %v348_v53  ;;  %v444_v60 = vpack.c.bf16 %v351_v56, %v350_v55  ;;  %v240_v53 = vld [vmem:[%s3575_s1 + $0x2b0] sm:$0xff]  ;;  %v241_v54 = vld [vmem:[%s3575_s1 + $0x2b8] sm:$0xff]  ;;  %v114_v55 = vld [vmem:[%s3574_s0 + $0x2c0] sm:$0xff] }
  0x68   :  { %v115_v56 = vld [vmem:[%s3574_s0 + $0x2c8] sm:$0xff] }
  0x6c   :  { %2170 = vmatmul.mubr.msk.bf16.gmra.mrb[48].mxu0 %vm487_vm0, %v435_v1  ;;  %v226_v1 = vld [vmem:[%s3575_s1 + $0x240] sm:$0xff] }
  0x6d   :  { %2173 = vmatprep.mubr.msk.bf16.mxu0 %vm487_vm0, %v436_v4  ;;  %v353_v4 = vmul.f32 %v225_v62, %v97_v59  ;;  %v354_v5 = vmul.f32 %v226_v1, %v98_v63  ;;  %v368_v59 = vmul.f32 %v240_v53, %v112_v50  ;;  %v371_v62 = vmul.f32 %v243_v58, %v115_v56  ;;  %v117_v1 = vld [vmem:[%s3574_s0 + $0x2d8] sm:$0xff]  ;;  %v131_v50 = vld [vmem:[%s3574_s0 + $0x348] sm:$0xff]  ;;  %v132_v58 = vld [vmem:[%s3574_s0 + $0x350] sm:$0xff] }
  0x6f   :  { %v445_v7 = vpack.c.bf16 %v353_v4, %v352_v3  ;;  %v446_v10 = vpack.c.bf16 %v355_v6, %v354_v5  ;;  %v244_v3 = vld [vmem:[%s3575_s1 + $0x2d0] sm:$0xff]  ;;  %v245_v4 = vld [vmem:[%s3575_s1 + $0x2d8] sm:$0xff]  ;;  %v118_v5 = vld [vmem:[%s3574_s0 + $0x2e0] sm:$0xff] }
  0x70   :  { %v119_v6 = vld [vmem:[%s3574_s0 + $0x2e8] sm:$0xff] }
  0x74   :  { %2174 = vmatmul.mubr.msk.bf16.gmra.mrb[52].mxu0 %vm487_vm0, %v437_v15  ;;  %v230_v15 = vld [vmem:[%s3575_s1 + $0x260] sm:$0xff] }
  0x75   :  { %2177 = vmatprep.mubr.msk.bf16.mxu0 %vm487_vm0, %v438_v18  ;;  %v357_v18 = vmul.f32 %v229_v12, %v101_v9  ;;  %v358_v19 = vmul.f32 %v230_v15, %v102_v13  ;;  %v372_v9 = vmul.f32 %v244_v3, %v116_v0  ;;  %v375_v12 = vmul.f32 %v247_v8, %v119_v6  ;;  %v121_v15 = vld [vmem:[%s3574_s0 + $0x2f8] sm:$0xff]  ;;  %v135_v0 = vld [vmem:[%s3574_s0 + $0x368] sm:$0xff]  ;;  %v136_v8 = vld [vmem:[%s3574_s0 + $0x370] sm:$0xff] }
  0x77   :  { %v447_v21 = vpack.c.bf16 %v357_v18, %v356_v17  ;;  %v448_v24 = vpack.c.bf16 %v359_v20, %v358_v19  ;;  %v248_v17 = vld [vmem:[%s3575_s1 + $0x2f0] sm:$0xff]  ;;  %v249_v18 = vld [vmem:[%s3575_s1 + $0x2f8] sm:$0xff]  ;;  %v122_v19 = vld [vmem:[%s3574_s0 + $0x300] sm:$0xff] }
  0x78   :  { %v123_v20 = vld [vmem:[%s3574_s0 + $0x308] sm:$0xff] }
  0x7c   :  { %2178 = vmatmul.mubr.msk.bf16.gmra.mrb[56].mxu0 %vm487_vm0, %v439_v29  ;;  %v234_v29 = vld [vmem:[%s3575_s1 + $0x280] sm:$0xff] }
  0x7d   :  { %2181 = vmatprep.mubr.msk.bf16.mxu0 %vm487_vm0, %v440_v32  ;;  %v361_v32 = vmul.f32 %v233_v26, %v105_v23  ;;  %v362_v33 = vmul.f32 %v234_v29, %v106_v27  ;;  %v376_v23 = vmul.f32 %v248_v17, %v120_v14  ;;  %v379_v26 = vmul.f32 %v251_v22, %v123_v20  ;;  %v125_v29 = vld [vmem:[%s3574_s0 + $0x318] sm:$0xff]  ;;  %v139_v14 = vld [vmem:[%s3574_s0 + $0x388] sm:$0xff] }
  0x7f   :  { %v449_v35 = vpack.c.bf16 %v361_v32, %v360_v31  ;;  %v450_v38 = vpack.c.bf16 %v363_v34, %v362_v33  ;;  %v252_v31 = vld [vmem:[%s3575_s1 + $0x310] sm:$0xff]  ;;  %v253_v32 = vld [vmem:[%s3575_s1 + $0x318] sm:$0xff]  ;;  %v126_v33 = vld [vmem:[%s3574_s0 + $0x320] sm:$0xff] }
  0x80   :  { %v127_v34 = vld [vmem:[%s3574_s0 + $0x328] sm:$0xff] }
  0x84   :  { %2182 = vmatmul.mubr.msk.bf16.gmra.mrb[60].mxu0 %vm487_vm0, %v441_v43  ;;  %v238_v43 = vld [vmem:[%s3575_s1 + $0x2a0] sm:$0xff] }
  0x85   :  { %2185 = vmatprep.mubr.msk.bf16.mxu0 %vm487_vm0, %v442_v46  ;;  %v365_v46 = vmul.f32 %v237_v40, %v109_v37  ;;  %v366_v47 = vmul.f32 %v238_v43, %v110_v41  ;;  %v380_v37 = vmul.f32 %v252_v31, %v124_v28  ;;  %v383_v40 = vmul.f32 %v255_v36, %v127_v34  ;;  %v1353_v41 = vld [vmem:[%s3578_s4] sm:$0x1]  ;;  %v268_v31 = vld [vmem:[%s3575_s1 + $0x390] sm:$0xff]  ;;  %v143_v36 = vld [vmem:[%s3574_s0 + $0x3a8] sm:$0xff] }
  0x86   :  { %v3053_v42 = vpack.c.bf16 %v1353_v41, %v1353_v41 }
  0x87   :  { %v451_v49 = vpack.c.bf16 %v365_v46, %v364_v45  ;;  %v452_v52 = vpack.c.bf16 %v367_v48, %v366_v47  ;;  %v129_v45 = vld [vmem:[%s3574_s0 + $0x338] sm:$0xff]  ;;  %v256_v47 = vld [vmem:[%s3575_s1 + $0x330] sm:$0xff] }
  0x88   :  { %2061 = vmatprep.mubr.msk.bf16.mxu1 %vm1421_vm1, %v3053_v42  ;;  %v257_v48 = vld [vmem:[%s3575_s1 + $0x338] sm:$0xff]  ;;  %v384_v53 = vmul.f32 %v256_v47, %v128_v44 }
  0x8c   :  { %2186 = vmatmul.mubr.msk.bf16.gmra.mrb[64].mxu0 %vm487_vm0, %v443_v57  ;;  %v242_v57 = vld [vmem:[%s3575_s1 + $0x2c0] sm:$0xff] }
  0x8d   :  { %2189 = vmatprep.mubr.msk.bf16.mxu0 %vm487_vm0, %v444_v60  ;;  %v369_v60 = vmul.f32 %v241_v54, %v113_v51  ;;  %v370_v61 = vmul.f32 %v242_v57, %v114_v55  ;;  %v258_v51 = vld [vmem:[%s3575_s1 + $0x340] sm:$0xff]  ;;  %v385_v54 = vmul.f32 %v257_v48, %v129_v45 }
  0x8f   :  { %v453_v63 = vpack.c.bf16 %v369_v60, %v368_v59  ;;  %v454_v2 = vpack.c.bf16 %v371_v62, %v370_v61  ;;  %v461_v57 = vpack.c.bf16 %v385_v54, %v384_v53  ;;  %v133_v59 = vld [vmem:[%s3574_s0 + $0x358] sm:$0xff]  ;;  %v260_v61 = vld [vmem:[%s3575_s1 + $0x350] sm:$0xff] }
  0x90   :  { %v261_v62 = vld [vmem:[%s3575_s1 + $0x358] sm:$0xff]  ;;  %v388_v3 = vmul.f32 %v260_v61, %v132_v58 }
  0x91   :  { %v273_v61 = vld [vmem:[%s3575_s1 + $0x3b8] sm:$0xff] }
  0x94   :  { %2190 = vmatmul.mubr.msk.bf16.gmra.mrb[68].mxu0 %vm487_vm0, %v445_v7  ;;  %v246_v7 = vld [vmem:[%s3575_s1 + $0x2e0] sm:$0xff] }
  0x95   :  { %2193 = vmatprep.mubr.msk.bf16.mxu0 %vm487_vm0, %v446_v10  ;;  %v373_v10 = vmul.f32 %v245_v4, %v117_v1  ;;  %v374_v11 = vmul.f32 %v246_v7, %v118_v5  ;;  %v262_v1 = vld [vmem:[%s3575_s1 + $0x360] sm:$0xff]  ;;  %v389_v4 = vmul.f32 %v261_v62, %v133_v59 }
  0x96   :  { %v146_v62 = vld [vmem:[%s3574_s0 + $0x3c0] sm:$0xff] }
  0x97   :  { %v455_v13 = vpack.c.bf16 %v373_v10, %v372_v9  ;;  %v456_v16 = vpack.c.bf16 %v375_v12, %v374_v11  ;;  %v463_v7 = vpack.c.bf16 %v389_v4, %v388_v3  ;;  %v137_v9 = vld [vmem:[%s3574_s0 + $0x378] sm:$0xff]  ;;  %v264_v11 = vld [vmem:[%s3575_s1 + $0x370] sm:$0xff]  ;;  %v275_v3 = vld [vmem:[%s3575_s1 + $0x3c8] sm:$0xff] }
  0x98   :  { %v265_v12 = vld [vmem:[%s3575_s1 + $0x378] sm:$0xff]  ;;  %v392_v17 = vmul.f32 %v264_v11, %v136_v8 }
  0x9c   :  { %2194 = vmatmul.mubr.msk.bf16.gmra.mrb[72].mxu0 %vm487_vm0, %v447_v21  ;;  %v250_v21 = vld [vmem:[%s3575_s1 + $0x300] sm:$0xff] }
  0x9d   :  { %2197 = vmatprep.mubr.msk.bf16.mxu0 %vm487_vm0, %v448_v24  ;;  %v377_v24 = vmul.f32 %v249_v18, %v121_v15  ;;  %v378_v25 = vmul.f32 %v250_v21, %v122_v19  ;;  %v266_v15 = vld [vmem:[%s3575_s1 + $0x380] sm:$0xff]  ;;  %v393_v18 = vmul.f32 %v265_v12, %v137_v9 }
  0x9e   :  { %v3137_v19 = vld [vmem:[%s3577_s3] ss:$0 sm:$0xff] }
  0x9f   :  { %v457_v27 = vpack.c.bf16 %v377_v24, %v376_v23  ;;  %v458_v30 = vpack.c.bf16 %v379_v26, %v378_v25  ;;  %v465_v25 = vpack.c.bf16 %v393_v18, %v392_v17  ;;  %v140_v26 = vld [vmem:[%s3574_s0 + $0x390] sm:$0xff] }
  0xa4   :  { %2198 = vmatmul.mubr.msk.bf16.gmra.mrb[76].mxu0 %vm487_vm0, %v449_v35  ;;  %v254_v35 = vld [vmem:[%s3575_s1 + $0x320] sm:$0xff] }
  0xa5   :  { %2201 = vmatprep.mubr.msk.bf16.mxu0 %vm487_vm0, %v450_v38  ;;  %v381_v38 = vmul.f32 %v253_v32, %v125_v29  ;;  %v382_v39 = vmul.f32 %v254_v35, %v126_v33  ;;  %v269_v32 = vld [vmem:[%s3575_s1 + $0x398] sm:$0xff]  ;;  %v142_v33 = vld [vmem:[%s3574_s0 + $0x3a0] sm:$0xff] }
  0xa7   :  { %v459_v43 = vpack.c.bf16 %v381_v38, %v380_v37  ;;  %v460_v46 = vpack.c.bf16 %v383_v40, %v382_v39  ;;  %v270_v37 = vld [vmem:[%s3575_s1 + $0x3a0] sm:$0xff]  ;;  %v271_v38 = vld [vmem:[%s3575_s1 + $0x3a8] sm:$0xff] }
  0xa8   :  { %v398_v47 = vmul.f32 %v270_v37, %v142_v33  ;;  %v399_v48 = vmul.f32 %v271_v38, %v143_v36 }
  0xaa   :  { %v468_v59 = vpack.c.bf16 %v399_v48, %v398_v47 }
  0xac   :  { %2202 = vmatmul.mubr.msk.bf16.gmra.mrb[80].mxu0 %vm487_vm0, %v451_v49  ;;  %v130_v49 = vld [vmem:[%s3574_s0 + $0x340] sm:$0xff] }
  0xad   :  { %2205 = vmatprep.mubr.msk.bf16.mxu0 %vm487_vm0, %v452_v52  ;;  %v259_v52 = vld [vmem:[%s3575_s1 + $0x348] sm:$0xff]  ;;  %v386_v55 = vmul.f32 %v258_v51, %v130_v49 }
  0xae   :  { %v387_v56 = vmul.f32 %v259_v52, %v131_v50 }
  0xb0   :  { %v462_v60 = vpack.c.bf16 %v387_v56, %v386_v55  ;;  %v144_v55 = vld [vmem:[%s3574_s0 + $0x3b0] sm:$0xff]  ;;  %v145_v56 = vld [vmem:[%s3574_s0 + $0x3b8] sm:$0xff] }
  0xb1   :  { %v401_v8 = vmul.f32 %v273_v61, %v145_v56  ;;  %v280_v56 = vld [vmem:[%s3575_s1 + $0x3f0] sm:$0xff] }
  0xb4   :  { %2206 = vmatmul.mubr.msk.bf16.gmra.mrb[84].mxu0 %vm487_vm0, %v453_v63  ;;  %v134_v63 = vld [vmem:[%s3574_s0 + $0x360] sm:$0xff] }
  0xb5   :  { %2209 = vmatprep.mubr.msk.bf16.mxu0 %vm487_vm0, %v454_v2  ;;  %v263_v2 = vld [vmem:[%s3575_s1 + $0x368] sm:$0xff]  ;;  %v390_v5 = vmul.f32 %v262_v1, %v134_v63 }
  0xb6   :  { %v391_v6 = vmul.f32 %v263_v2, %v135_v0  ;;  %v147_v1 = vld [vmem:[%s3574_s0 + $0x3c8] sm:$0xff]  ;;  %v274_v2 = vld [vmem:[%s3575_s1 + $0x3c0] sm:$0xff] }
  0xb7   :  { %v402_v11 = vmul.f32 %v274_v2, %v146_v62  ;;  %v403_v12 = vmul.f32 %v275_v3, %v147_v1 }
  0xb8   :  { %v464_v10 = vpack.c.bf16 %v391_v6, %v390_v5 }
  0xbc   :  { %2210 = vmatmul.mubr.msk.bf16.gmra.mrb[88].mxu0 %vm487_vm0, %v455_v13  ;;  %v138_v13 = vld [vmem:[%s3574_s0 + $0x380] sm:$0xff] }
  0xbd   :  { %2213 = vmatprep.mubr.msk.bf16.mxu0 %vm487_vm0, %v456_v16  ;;  %v267_v16 = vld [vmem:[%s3575_s1 + $0x388] sm:$0xff]  ;;  %v394_v20 = vmul.f32 %v266_v15, %v138_v13 }
  0xbe   :  { %v395_v21 = vmul.f32 %v267_v16, %v139_v14 }
  0xc4   :  { %2214 = vmatmul.mubr.msk.bf16.gmra.mrb[92].mxu0 %vm487_vm0, %v457_v27  ;;  %v141_v27 = vld [vmem:[%s3574_s0 + $0x398] sm:$0xff] }
  0xc5   :  { %2217 = vmatprep.mubr.msk.bf16.mxu0 %vm487_vm0, %v458_v30  ;;  %v466_v30 = vpack.c.bf16 %v395_v21, %v394_v20  ;;  %v397_v44 = vmul.f32 %v269_v32, %v141_v27  ;;  %v148_v20 = vld [vmem:[%s3574_s0 + $0x3d0] sm:$0xff]  ;;  %v149_v21 = vld [vmem:[%s3574_s0 + $0x3d8] sm:$0xff]  ;;  %v150_v27 = vld [vmem:[%s3574_s0 + $0x3e0] sm:$0xff] }
  0xc6   :  { %v279_v32 = vld [vmem:[%s3575_s1 + $0x3e8] sm:$0xff] }
  0xcc   :  { %2218 = vmatmul.mubr.msk.bf16.gmra.mrb[96].mxu0 %vm487_vm0, %v459_v43  ;;  %v396_v43 = vmul.f32 %v268_v31, %v140_v26  ;;  %v277_v26 = vld [vmem:[%s3575_s1 + $0x3d8] sm:$0xff]  ;;  %v278_v31 = vld [vmem:[%s3575_s1 + $0x3e0] sm:$0xff] }
  0xcd   :  { %2221 = vmatprep.mubr.msk.bf16.mxu0 %vm487_vm0, %v460_v46  ;;  %v405_v37 = vmul.f32 %v277_v26, %v149_v21 }
  0xce   :  { %v467_v54 = vpack.c.bf16 %v397_v44, %v396_v43 }
  0xd4   :  { %2222 = vmatmul.mubr.msk.bf16.gmra.mrb[100].mxu0 %vm487_vm0, %v461_v57 }
  0xd5   :  { %2225 = vmatprep.mubr.msk.bf16.mxu0 %vm487_vm0, %v462_v60  ;;  %v272_v60 = vld [vmem:[%s3575_s1 + $0x3b0] sm:$0xff] }
  0xdc   :  { %2226 = vmatmul.mubr.msk.bf16.gmra.mrb[104].mxu0 %vm487_vm0, %v463_v7  ;;  %v400_v7 = vmul.f32 %v272_v60, %v144_v55  ;;  %v153_v55 = vld [vmem:[%s3574_s0 + $0x3f8] sm:$0xff] }
  0xdd   :  { %2229 = vmatprep.mubr.msk.bf16.mxu0 %vm487_vm0, %v464_v10 }
  0xde   :  { %v469_v18 = vpack.c.bf16 %v401_v8, %v400_v7 }
  0xdf   :  { %v2123_v22 = vpop.f32.mrb[0].mxu0 }
  0xe0   :  { %v723_v23 = vadd.f32 %v2123_v22, %v3137_v19  ;;  %v714_v24 = vpop.f32.mrb[1].mxu0 }
  0xe1   :  { %v715_v28 = vadd.f32 %v3137_v19, %v714_v24  ;;  %v2124_v29 = vpop.f32.mrb[2].mxu0  ;;  %v470_v24 = vpack.c.bf16 %v403_v12, %v402_v11 }
  0xe2   :  { %v726_v34 = vadd.f32 %v2124_v29, %v3137_v19  ;;  %v717_v35 = vpop.f32.mrb[3].mxu0  ;;  %v1227_v40 = vmax.f32 %v723_v23, 0.0 }
  0xe3   :  { %v718_v39 = vadd.f32 %v3137_v19, %v717_v35  ;;  %v1225_v45 = vmax.f32 %v715_v28, 0.0 }
  0xe4   :  { %v1228_v41 = vmax.f32 %v726_v34, 0.0  ;;  %2230 = vmatmul.mubr.msk.bf16.gmra.mrb[108].mxu0 %vm487_vm0, %v465_v25  ;;  %v276_v25 = vld [vmem:[%s3575_s1 + $0x3d0] sm:$0xff] }
  0xe5   :  { %v1226_v46 = vmax.f32 %v718_v39, 0.0  ;;  %2233 = vmatprep.mubr.msk.bf16.mxu0 %vm487_vm0, %v466_v30  ;;  %v151_v30 = vld [vmem:[%s3574_s0 + $0x3e8] sm:$0xff]  ;;  %v404_v36 = vmul.f32 %v276_v25, %v148_v20 }
  0xe6   :  { %v3170_v49 = vpack.c.bf16 %v1228_v41, %v1227_v40  ;;  %v406_v40 = vmul.f32 %v278_v31, %v150_v27  ;;  %v407_v41 = vmul.f32 %v279_v32, %v151_v30 }
  0xe7   :  { %v2127_v50 = vpop.f32.mrb[4].mxu0  ;;  %v3172_v51 = vpack.c.bf16 %v1226_v46, %v1225_v45  ;;  %v471_v48 = vpack.c.bf16 %v405_v37, %v404_v36 }
  0xe8   :  { %v739_v52 = vadd.f32 %v2127_v50, %v3137_v19  ;;  %v730_v53 = vpop.f32.mrb[5].mxu0  ;;  %v152_v50 = vld [vmem:[%s3574_s0 + $0x3f0] sm:$0xff] }
  0xe9   :  { %v731_v57 = vadd.f32 %v3137_v19, %v730_v53  ;;  %v2128_v58 = vpop.f32.mrb[6].mxu0 }
  0xea   :  { %v742_v63 = vadd.f32 %v2128_v58, %v3137_v19  ;;  %v733_v0 = vpop.f32.mrb[7].mxu0  ;;  %v1231_v5 = vmax.f32 %v739_v52, 0.0 }
  0xeb   :  { %v734_v4 = vadd.f32 %v3137_v19, %v733_v0  ;;  %v1229_v9 = vmax.f32 %v731_v57, 0.0  ;;  %v281_v57 = vld [vmem:[%s3575_s1 + $0x3f8] sm:$0xff] }
  0xec   :  { %v1232_v6 = vmax.f32 %v742_v63, 0.0  ;;  %2234 = vmatmul.mubr.msk.bf16.gmra.mrb[112].mxu0 %vm487_vm0, %v467_v54  ;;  %v472_v54 = vpack.c.bf16 %v407_v41, %v406_v40  ;;  %v408_v63 = vmul.f32 %v280_v56, %v152_v50  ;;  %v409_v0 = vmul.f32 %v281_v57, %v153_v55 }
  0xed   :  { %v1230_v10 = vmax.f32 %v734_v4, 0.0  ;;  %2237 = vmatprep.mubr.msk.bf16.mxu0 %vm487_vm0, %v468_v59 }
  0xee   :  { %v3204_v13 = vpack.c.bf16 %v1232_v6, %v1231_v5  ;;  %v473_v8 = vpack.c.bf16 %v409_v0, %v408_v63 }
  0xef   :  { %v3206_v14 = vpack.c.bf16 %v1230_v10, %v1229_v9  ;;  %v2131_v15 = vpop.f32.mrb[8].mxu0 }
  0xf0   :  { %v755_v16 = vadd.f32 %v2131_v15, %v3137_v19  ;;  %v746_v17 = vpop.f32.mrb[9].mxu0 }
  0xf1   :  { %v747_v22 = vadd.f32 %v3137_v19, %v746_v17  ;;  %v2132_v23 = vpop.f32.mrb[10].mxu0 }
  0xf2   :  { %v758_v28 = vadd.f32 %v2132_v23, %v3137_v19  ;;  %v749_v29 = vpop.f32.mrb[11].mxu0  ;;  %v1235_v34 = vmax.f32 %v755_v16, 0.0 }
  0xf3   :  { %v750_v33 = vadd.f32 %v3137_v19, %v749_v29  ;;  %v1233_v38 = vmax.f32 %v747_v22, 0.0 }
  0xf4   :  { %v1236_v35 = vmax.f32 %v758_v28, 0.0  ;;  %2238 = vmatmul.mubr.msk.bf16.gmra.mrb[116].mxu0 %vm487_vm0, %v469_v18  ;;  %v1426_v28 = vsel %vm1421_vm1, %v3172_v51, 0 }
  0xf5   :  { %v1234_v39 = vmax.f32 %v750_v33, 0.0  ;;  %2241 = vmatprep.mubr.msk.bf16.mxu0 %vm487_vm0, %v470_v24 }
  0xf6   :  { %v3238_v43 = vpack.c.bf16 %v1236_v35, %v1235_v34 }
  0xf7   :  { %v3240_v44 = vpack.c.bf16 %v1234_v39, %v1233_v38  ;;  %v2135_v45 = vpop.f32.mrb[12].mxu0 }
  0xf8   :  { %v771_v46 = vadd.f32 %v2135_v45, %v3137_v19  ;;  %v762_v47 = vpop.f32.mrb[13].mxu0  ;;  %v1429_v45 = vsel %vm1421_vm1, %v3170_v49, 0 }
  0xf9   :  { %v763_v52 = vadd.f32 %v3137_v19, %v762_v47  ;;  %v2136_v53 = vpop.f32.mrb[14].mxu0 }
  0xfa   :  { %v774_v58 = vadd.f32 %v2136_v53, %v3137_v19  ;;  %v765_v59 = vpop.f32.mrb[15].mxu0  ;;  %v1239_v61 = vmax.f32 %v771_v46, 0.0 }
  0xfb   :  { %v766_v60 = vadd.f32 %v3137_v19, %v765_v59  ;;  %v1237_v1 = vmax.f32 %v763_v52, 0.0 }
  0xfc   :  { %v1240_v62 = vmax.f32 %v774_v58, 0.0  ;;  %2242 = vmatmul.mubr.msk.bf16.gmra.mrb[120].mxu0 %vm487_vm0, %v471_v48 }
  0xfd   :  { %v1238_v2 = vmax.f32 %v766_v60, 0.0  ;;  %2245 = vmatprep.mubr.msk.bf16.mxu0 %vm487_vm0, %v472_v54 }
  0xfe   :  { %v3260_v3 = vpack.c.bf16 %v1240_v62, %v1239_v61  ;;  %v1432_v61 = vsel %vm1421_vm1, %v3206_v14, 0 }
  0xff   :  { %v3262_v4 = vpack.c.bf16 %v1238_v2, %v1237_v1  ;;  %v2139_v5 = vpop.f32.mrb[16].mxu0 }
 0x100   :  { %v787_v6 = vadd.f32 %v2139_v5, %v3137_v19  ;;  %v778_v7 = vpop.f32.mrb[17].mxu0 }
 0x101   :  { %v779_v9 = vadd.f32 %v3137_v19, %v778_v7  ;;  %v2140_v10 = vpop.f32.mrb[18].mxu0 }
 0x102   :  { %v790_v11 = vadd.f32 %v2140_v10, %v3137_v19  ;;  %v781_v12 = vpop.f32.mrb[19].mxu0  ;;  %v1243_v16 = vmax.f32 %v787_v6, 0.0 }
 0x103   :  { %v782_v15 = vadd.f32 %v3137_v19, %v781_v12  ;;  %v1241_v18 = vmax.f32 %v779_v9, 0.0 }
 0x104   :  { %v1244_v17 = vmax.f32 %v790_v11, 0.0  ;;  %2246 = vmatmul.mubr.msk.bf16.gmra.mrb[124].mxu0 %vm487_vm0, %v473_v8 }
 0x105   :  { %v1242_v20 = vmax.f32 %v782_v15, 0.0  ;;  %v1435_v15 = vsel %vm1421_vm1, %v3204_v13, 0 }
 0x106   :  { %v1364_v21 = vpack.c.bf16 %v1244_v17, %v1243_v16 }
 0x107   :  { %v2143_v22 = vpop.f32.mrb[20].mxu0  ;;  %v1363_v23 = vpack.c.bf16 %v1242_v20, %v1241_v18 }
 0x108   :  { %v803_v24 = vadd.f32 %v2143_v22, %v3137_v19  ;;  %v794_v25 = vpop.f32.mrb[21].mxu0 }
 0x109   :  { %v795_v26 = vadd.f32 %v3137_v19, %v794_v25  ;;  %v2144_v27 = vpop.f32.mrb[22].mxu0  ;;  %2249 = vmatprep.subr.msk.bf16.mxu1 %vm1421_vm1, %v1363_v23 }
 0x10a   :  { %v806_v29 = vadd.f32 %v2144_v27, %v3137_v19  ;;  %v797_v30 = vpop.f32.mrb[23].mxu0  ;;  %2046 = vmatpush3.bf16.xpose.msra.mxu1 %v1426_v28  ;;  %v1247_v32 = vmax.f32 %v803_v24, 0.0 }
 0x10b   :  { %v798_v31 = vadd.f32 %v3137_v19, %v797_v30  ;;  %2250 = vmatprep.subr.msk.bf16.mxu1 %vm1421_vm1, %v1364_v21  ;;  %v1245_v34 = vmax.f32 %v795_v26, 0.0  ;;  %v1438_v30 = vsel %vm1421_vm1, %v3240_v44, 0 }
 0x10c   :  { %v1248_v33 = vmax.f32 %v806_v29, 0.0 }
 0x10d   :  { %v1246_v35 = vmax.f32 %v798_v31, 0.0 }
 0x10e   :  { %v1366_v36 = vpack.c.bf16 %v1248_v33, %v1247_v32 }
 0x10f   :  { %v1365_v37 = vpack.c.bf16 %v1246_v35, %v1245_v34  ;;  %v2147_v38 = vpop.f32.mrb[24].mxu0 }
 0x110   :  { %v819_v39 = vadd.f32 %v2147_v38, %v3137_v19  ;;  %v810_v40 = vpop.f32.mrb[25].mxu0 }
 0x111   :  { %v811_v51 = vadd.f32 %v3137_v19, %v810_v40  ;;  %v2148_v41 = vpop.f32.mrb[26].mxu0 }
 0x112   :  { %v822_v46 = vadd.f32 %v2148_v41, %v3137_v19  ;;  %v813_v47 = vpop.f32.mrb[27].mxu0  ;;  %2048 = vmatpush3.bf16.xpose.msra.mxu1 %v1429_v45  ;;  %v1251_v50 = vmax.f32 %v819_v39, 0.0 }
 0x113   :  { %v814_v48 = vadd.f32 %v3137_v19, %v813_v47  ;;  %2251 = vmatprep.subr.msk.bf16.mxu1 %vm1421_vm1, %v1365_v37  ;;  %v1249_v53 = vmax.f32 %v811_v51, 0.0 }
 0x114   :  { %v1252_v52 = vmax.f32 %v822_v46, 0.0  ;;  %v1441_v46 = vsel %vm1421_vm1, %v3238_v43, 0 }
 0x115   :  { %v1250_v54 = vmax.f32 %v814_v48, 0.0 }
 0x116   :  { %v1368_v55 = vpack.c.bf16 %v1252_v52, %v1251_v50 }
 0x117   :  { %v1367_v56 = vpack.c.bf16 %v1250_v54, %v1249_v53  ;;  %v2151_v57 = vpop.f32.mrb[28].mxu0 }
 0x118   :  { %v835_v58 = vadd.f32 %v2151_v57, %v3137_v19  ;;  %v826_v59 = vpop.f32.mrb[29].mxu0 }
 0x119   :  { %v827_v49 = vadd.f32 %v3137_v19, %v826_v59  ;;  %v2152_v60 = vpop.f32.mrb[30].mxu0 }
 0x11a   :  { %v838_v62 = vadd.f32 %v2152_v60, %v3137_v19  ;;  %v829_v63 = vpop.f32.mrb[31].mxu0  ;;  %2050 = vmatpush3.bf16.xpose.msra.mxu1 %v1432_v61  ;;  %v1255_v1 = vmax.f32 %v835_v58, 0.0  ;;  %v1444_v61 = vsel %vm1421_vm1, %v3262_v4, 0 }
 0x11b   :  { %v830_v0 = vadd.f32 %v3137_v19, %v829_v63  ;;  %2252 = vmatprep.subr.msk.bf16.mxu1 %vm1421_vm1, %v1366_v36  ;;  %v1253_v5 = vmax.f32 %v827_v49, 0.0 }
 0x11c   :  { %v1256_v2 = vmax.f32 %v838_v62, 0.0 }
 0x11d   :  { %v1254_v6 = vmax.f32 %v830_v0, 0.0 }
 0x11e   :  { %v3291_v7 = vpack.c.bf16 %v1256_v2, %v1255_v1 }
 0x11f   :  { %v1369_v8 = vpack.c.bf16 %v1254_v6, %v1253_v5  ;;  %v2155_v9 = vpop.f32.mrb[32].mxu0 }
 0x120   :  { %v851_v10 = vadd.f32 %v2155_v9, %v3137_v19  ;;  %v842_v11 = vpop.f32.mrb[33].mxu0 }
 0x121   :  { %v843_v14 = vadd.f32 %v3137_v19, %v842_v11  ;;  %v2156_v12 = vpop.f32.mrb[34].mxu0 }
 0x122   :  { %v854_v16 = vadd.f32 %v2156_v12, %v3137_v19  ;;  %v845_v17 = vpop.f32.mrb[35].mxu0  ;;  %2052 = vmatpush3.bf16.xpose.msra.mxu1 %v1435_v15  ;;  %v1259_v20 = vmax.f32 %v851_v10, 0.0  ;;  %v1447_v15 = vsel %vm1421_vm1, %v3260_v3, 0 }
 0x123   :  { %v846_v18 = vadd.f32 %v3137_v19, %v845_v17  ;;  %2253 = vmatprep.subr.msk.bf16.mxu1 %vm1421_vm1, %v1367_v56  ;;  %v1257_v22 = vmax.f32 %v843_v14, 0.0 }
 0x124   :  { %v1260_v21 = vmax.f32 %v854_v16, 0.0 }
 0x125   :  { %v1258_v23 = vmax.f32 %v846_v18, 0.0 }
 0x126   :  { %v3300_v24 = vpack.c.bf16 %v1260_v21, %v1259_v20 }
 0x127   :  { %v3302_v25 = vpack.c.bf16 %v1258_v23, %v1257_v22  ;;  %v2159_v26 = vpop.f32.mrb[36].mxu0 }
 0x128   :  { %v867_v27 = vadd.f32 %v2159_v26, %v3137_v19  ;;  %v858_v13 = vpop.f32.mrb[37].mxu0 }
 0x129   :  { %v859_v28 = vadd.f32 %v3137_v19, %v858_v13  ;;  %v2160_v29 = vpop.f32.mrb[38].mxu0  ;;  %v1474_v3 = vsel %vm1421_vm1, %v3302_v25, 0 }
 0x12a   :  { %v870_v31 = vadd.f32 %v2160_v29, %v3137_v19  ;;  %v861_v32 = vpop.f32.mrb[39].mxu0  ;;  %2054 = vmatpush3.bf16.xpose.msra.mxu1 %v1438_v30  ;;  %v1263_v34 = vmax.f32 %v867_v27, 0.0 }
 0x12b   :  { %v862_v33 = vadd.f32 %v3137_v19, %v861_v32  ;;  %2254 = vmatprep.subr.msk.bf16.mxu1 %vm1421_vm1, %v1368_v55  ;;  %v1261_v36 = vmax.f32 %v859_v28, 0.0 }
 0x12c   :  { %v1264_v35 = vmax.f32 %v870_v31, 0.0 }
 0x12d   :  { %v1262_v37 = vmax.f32 %v862_v33, 0.0 }
 0x12e   :  { %v3311_v38 = vpack.c.bf16 %v1264_v35, %v1263_v34 }
 0x12f   :  { %v3313_v39 = vpack.c.bf16 %v1262_v37, %v1261_v36  ;;  %v2163_v40 = vpop.f32.mrb[40].mxu0 }
 0x130   :  { %v883_v51 = vadd.f32 %v2163_v40, %v3137_v19  ;;  %v874_v44 = vpop.f32.mrb[41].mxu0 }
 0x131   :  { %v875_v41 = vadd.f32 %v3137_v19, %v874_v44  ;;  %v2164_v45 = vpop.f32.mrb[42].mxu0 }
 0x132   :  { %v886_v47 = vadd.f32 %v2164_v45, %v3137_v19  ;;  %v877_v48 = vpop.f32.mrb[43].mxu0  ;;  %2056 = vmatpush3.bf16.xpose.msra.mxu1 %v1441_v46  ;;  %v1267_v52 = vmax.f32 %v883_v51, 0.0 }
 0x133   :  { %v878_v50 = vadd.f32 %v3137_v19, %v877_v48  ;;  %2255 = vmatprep.subr.msk.bf16.mxu1 %vm1421_vm1, %v1369_v8  ;;  %v1265_v54 = vmax.f32 %v875_v41, 0.0 }
 0x134   :  { %v1268_v53 = vmax.f32 %v886_v47, 0.0  ;;  %v1477_v47 = vsel %vm1421_vm1, %v3300_v24, 0 }
 0x135   :  { %v1266_v55 = vmax.f32 %v878_v50, 0.0 }
 0x136   :  { %v3322_v56 = vpack.c.bf16 %v1268_v53, %v1267_v52 }
 0x137   :  { %v3324_v57 = vpack.c.bf16 %v1266_v55, %v1265_v54  ;;  %v2167_v58 = vpop.f32.mrb[44].mxu0 }
 0x138   :  { %v899_v59 = vadd.f32 %v2167_v58, %v3137_v19  ;;  %v890_v43 = vpop.f32.mrb[45].mxu0 }
 0x139   :  { %v891_v49 = vadd.f32 %v3137_v19, %v890_v43  ;;  %v2168_v60 = vpop.f32.mrb[46].mxu0 }
 0x13a   :  { %v902_v62 = vadd.f32 %v2168_v60, %v3137_v19  ;;  %v893_v63 = vpop.f32.mrb[47].mxu0  ;;  %2058 = vmatpush3.bf16.xpose.msra.mxu1 %v1444_v61  ;;  %v1271_v1 = vmax.f32 %v899_v59, 0.0 }
 0x13b   :  { %v894_v0 = vadd.f32 %v3137_v19, %v893_v63  ;;  %2256 = vmatprep.subr.msk.bf16.mxu1 %vm1421_vm1, %v3291_v7  ;;  %v1269_v5 = vmax.f32 %v891_v49, 0.0  ;;  %v1480_v63 = vsel %vm1421_vm1, %v3313_v39, 0 }
 0x13c   :  { %v1272_v2 = vmax.f32 %v902_v62, 0.0 }
 0x13d   :  { %v1270_v6 = vmax.f32 %v894_v0, 0.0 }
 0x13e   :  { %v3334_v8 = vpack.c.bf16 %v1272_v2, %v1271_v1 }
 0x13f   :  { %v3336_v9 = vpack.c.bf16 %v1270_v6, %v1269_v5  ;;  %v2171_v10 = vpop.f32.mrb[48].mxu0 }
 0x140   :  { %v915_v4 = vadd.f32 %v2171_v10, %v3137_v19  ;;  %v906_v11 = vpop.f32.mrb[49].mxu0 }
 0x141   :  { %v907_v14 = vadd.f32 %v3137_v19, %v906_v11  ;;  %v2172_v12 = vpop.f32.mrb[50].mxu0 }
 0x142   :  { %v918_v7 = vadd.f32 %v2172_v12, %v3137_v19  ;;  %v909_v16 = vpop.f32.mrb[51].mxu0  ;;  %2060 = vmatpush3.bf16.xpose.msra.mxu1 %v1447_v15  ;;  %v1275_v18 = vmax.f32 %v915_v4, 0.0 }
 0x143   :  { %v910_v17 = vadd.f32 %v3137_v19, %v909_v16  ;;  %v1273_v21 = vmax.f32 %v907_v14, 0.0 }
 0x144   :  { %v1276_v20 = vmax.f32 %v918_v7, 0.0 }
 0x145   :  { %v1274_v22 = vmax.f32 %v910_v17, 0.0  ;;  %v1483_v17 = vsel %vm1421_vm1, %v3311_v38, 0 }
 0x146   :  { %v1380_v23 = vpack.c.bf16 %v1276_v20, %v1275_v18 }
 0x147   :  { %v1379_v26 = vpack.c.bf16 %v1274_v22, %v1273_v21  ;;  %v2175_v27 = vpop.f32.mrb[52].mxu0 }
 0x148   :  { %v931_v13 = vadd.f32 %v2175_v27, %v3137_v19  ;;  %v922_v28 = vpop.f32.mrb[53].mxu0 }
 0x149   :  { %v923_v29 = vadd.f32 %v3137_v19, %v922_v28  ;;  %v2176_v30 = vpop.f32.mrb[54].mxu0  ;;  %2062 = vmatmul.mubr.msk.bf16.vlgmr.msra.gmra.mrb[0].mxu1 %vm1421_vm1, %v3053_v42  ;;  %2257 = vmatprep.subr.msk.bf16.mxu1 %vm1421_vm1, %v1379_v26 }
 0x14a   :  { %v934_v31 = vadd.f32 %v2176_v30, %v3137_v19  ;;  %v925_v32 = vpop.f32.mrb[55].mxu0  ;;  %2064 = vmatpush3.bf16.xpose.msra.mxu1 %v1474_v3  ;;  %2079 = vmatprep.mubr.msk.bf16.mxu1 %vm1421_vm1, %v3053_v42  ;;  %v1279_v34 = vmax.f32 %v931_v13, 0.0 }
 0x14b   :  { %v926_v33 = vadd.f32 %v3137_v19, %v925_v32  ;;  %2258 = vmatprep.subr.msk.bf16.mxu1 %vm1421_vm1, %v1380_v23  ;;  %v1277_v36 = vmax.f32 %v923_v29, 0.0  ;;  %v1486_v32 = vsel %vm1421_vm1, %v3324_v57, 0 }
 0x14c   :  { %v1280_v35 = vmax.f32 %v934_v31, 0.0 }
 0x14d   :  { %v1278_v37 = vmax.f32 %v926_v33, 0.0 }
 0x14e   :  { %v1382_v40 = vpack.c.bf16 %v1280_v35, %v1279_v34 }
 0x14f   :  { %v1381_v51 = vpack.c.bf16 %v1278_v37, %v1277_v36  ;;  %v2179_v44 = vpop.f32.mrb[56].mxu0 }
 0x150   :  { %v947_v25 = vadd.f32 %v2179_v44, %v3137_v19  ;;  %v938_v41 = vpop.f32.mrb[57].mxu0 }
 0x151   :  { %v939_v45 = vadd.f32 %v3137_v19, %v938_v41  ;;  %v2180_v46 = vpop.f32.mrb[58].mxu0 }
 0x152   :  { %v950_v48 = vadd.f32 %v2180_v46, %v3137_v19  ;;  %v941_v50 = vpop.f32.mrb[59].mxu0  ;;  %2066 = vmatpush3.bf16.xpose.msra.mxu1 %v1477_v47  ;;  %v1283_v53 = vmax.f32 %v947_v25, 0.0 }
 0x153   :  { %v942_v52 = vadd.f32 %v3137_v19, %v941_v50  ;;  %2259 = vmatprep.subr.msk.bf16.mxu1 %vm1421_vm1, %v1381_v51  ;;  %v1281_v55 = vmax.f32 %v939_v45, 0.0 }
 0x154   :  { %v1284_v54 = vmax.f32 %v950_v48, 0.0  ;;  %v1489_v48 = vsel %vm1421_vm1, %v3322_v56, 0 }
 0x155   :  { %v1282_v58 = vmax.f32 %v942_v52, 0.0 }
 0x156   :  { %v1384_v59 = vpack.c.bf16 %v1284_v54, %v1283_v53 }
 0x157   :  { %v1383_v43 = vpack.c.bf16 %v1282_v58, %v1281_v55  ;;  %v2183_v49 = vpop.f32.mrb[60].mxu0 }
 0x158   :  { %v963_v60 = vadd.f32 %v2183_v49, %v3137_v19  ;;  %v954_v61 = vpop.f32.mrb[61].mxu0 }
 0x159   :  { %v955_v24 = vadd.f32 %v3137_v19, %v954_v61  ;;  %v2184_v62 = vpop.f32.mrb[62].mxu0 }
 0x15a   :  { %v966_v0 = vadd.f32 %v2184_v62, %v3137_v19  ;;  %v957_v1 = vpop.f32.mrb[63].mxu0  ;;  %2068 = vmatpush3.bf16.xpose.msra.mxu1 %v1480_v63  ;;  %v1287_v5 = vmax.f32 %v963_v60, 0.0  ;;  %v1492_v63 = vsel %vm1421_vm1, %v3336_v9, 0 }
 0x15b   :  { %v958_v2 = vadd.f32 %v3137_v19, %v957_v1  ;;  %2260 = vmatprep.subr.msk.bf16.mxu1 %vm1421_vm1, %v1382_v40  ;;  %v1285_v10 = vmax.f32 %v955_v24, 0.0 }
 0x15c   :  { %v1288_v6 = vmax.f32 %v966_v0, 0.0 }
 0x15d   :  { %v1286_v4 = vmax.f32 %v958_v2, 0.0 }
 0x15e   :  { %v3370_v11 = vpack.c.bf16 %v1288_v6, %v1287_v5 }
 0x15f   :  { %v1385_v14 = vpack.c.bf16 %v1286_v4, %v1285_v10  ;;  %v2187_v12 = vpop.f32.mrb[64].mxu0 }
 0x160   :  { %v979_v15 = vadd.f32 %v2187_v12, %v3137_v19  ;;  %v970_v7 = vpop.f32.mrb[65].mxu0 }
 0x161   :  { %v971_v39 = vadd.f32 %v3137_v19, %v970_v7  ;;  %v2188_v16 = vpop.f32.mrb[66].mxu0 }
 0x162   :  { %v982_v18 = vadd.f32 %v2188_v16, %v3137_v19  ;;  %v973_v20 = vpop.f32.mrb[67].mxu0  ;;  %2070 = vmatpush3.bf16.xpose.msra.mxu1 %v1483_v17  ;;  %v1291_v22 = vmax.f32 %v979_v15, 0.0  ;;  %v1495_v17 = vsel %vm1421_vm1, %v3334_v8, 0 }
 0x163   :  { %v974_v21 = vadd.f32 %v3137_v19, %v973_v20  ;;  %2261 = vmatprep.subr.msk.bf16.mxu1 %vm1421_vm1, %v1383_v43  ;;  %v1289_v26 = vmax.f32 %v971_v39, 0.0 }
 0x164   :  { %v1292_v23 = vmax.f32 %v982_v18, 0.0 }
 0x165   :  { %v1290_v27 = vmax.f32 %v974_v21, 0.0 }
 0x166   :  { %v3379_v13 = vpack.c.bf16 %v1292_v23, %v1291_v22 }
 0x167   :  { %v3381_v28 = vpack.c.bf16 %v1290_v27, %v1289_v26  ;;  %v2191_v29 = vpop.f32.mrb[68].mxu0 }
 0x168   :  { %v995_v30 = vadd.f32 %v2191_v29, %v3137_v19  ;;  %v986_v38 = vpop.f32.mrb[69].mxu0 }
 0x169   :  { %v987_v3 = vadd.f32 %v3137_v19, %v986_v38  ;;  %v2192_v31 = vpop.f32.mrb[70].mxu0  ;;  %v1522_v8 = vsel %vm1421_vm1, %v3381_v28, 0 }
 0x16a   :  { %v998_v33 = vadd.f32 %v2192_v31, %v3137_v19  ;;  %v989_v34 = vpop.f32.mrb[71].mxu0  ;;  %2072 = vmatpush3.bf16.xpose.msra.mxu1 %v1486_v32  ;;  %v1295_v36 = vmax.f32 %v995_v30, 0.0 }
 0x16b   :  { %v990_v35 = vadd.f32 %v3137_v19, %v989_v34  ;;  %2262 = vmatprep.subr.msk.bf16.mxu1 %vm1421_vm1, %v1384_v59  ;;  %v1293_v40 = vmax.f32 %v987_v3, 0.0 }
 0x16c   :  { %v1296_v37 = vmax.f32 %v998_v33, 0.0 }
 0x16d   :  { %v1294_v51 = vmax.f32 %v990_v35, 0.0 }
 0x16e   :  { %v3390_v44 = vpack.c.bf16 %v1296_v37, %v1295_v36 }
 0x16f   :  { %v3392_v25 = vpack.c.bf16 %v1294_v51, %v1293_v40  ;;  %v2195_v41 = vpop.f32.mrb[72].mxu0 }
 0x170   :  { %v1011_v45 = vadd.f32 %v2195_v41, %v3137_v19  ;;  %v1002_v57 = vpop.f32.mrb[73].mxu0 }
 0x171   :  { %v1003_v46 = vadd.f32 %v3137_v19, %v1002_v57  ;;  %v2196_v47 = vpop.f32.mrb[74].mxu0 }
 0x172   :  { %v1014_v50 = vadd.f32 %v2196_v47, %v3137_v19  ;;  %v1005_v52 = vpop.f32.mrb[75].mxu0  ;;  %2074 = vmatpush3.bf16.xpose.msra.mxu1 %v1489_v48  ;;  %v1299_v54 = vmax.f32 %v1011_v45, 0.0 }
 0x173   :  { %v1006_v53 = vadd.f32 %v3137_v19, %v1005_v52  ;;  %2263 = vmatprep.subr.msk.bf16.mxu1 %vm1421_vm1, %v1385_v14  ;;  %v1297_v58 = vmax.f32 %v1003_v46, 0.0 }
 0x174   :  { %v1300_v55 = vmax.f32 %v1014_v50, 0.0  ;;  %v1525_v50 = vsel %vm1421_vm1, %v3379_v13, 0 }
 0x175   :  { %v1298_v59 = vmax.f32 %v1006_v53, 0.0 }
 0x176   :  { %v3401_v43 = vpack.c.bf16 %v1300_v55, %v1299_v54 }
 0x177   :  { %v3403_v49 = vpack.c.bf16 %v1298_v59, %v1297_v58  ;;  %v2199_v60 = vpop.f32.mrb[76].mxu0 }
 0x178   :  { %v1027_v61 = vadd.f32 %v2199_v60, %v3137_v19  ;;  %v1018_v56 = vpop.f32.mrb[77].mxu0 }
 0x179   :  { %v1019_v24 = vadd.f32 %v3137_v19, %v1018_v56  ;;  %v2200_v62 = vpop.f32.mrb[78].mxu0 }
 0x17a   :  { %v1030_v0 = vadd.f32 %v2200_v62, %v3137_v19  ;;  %v1021_v1 = vpop.f32.mrb[79].mxu0  ;;  %2076 = vmatpush3.bf16.xpose.msra.mxu1 %v1492_v63  ;;  %v1303_v5 = vmax.f32 %v1027_v61, 0.0 }
 0x17b   :  { %v1022_v2 = vadd.f32 %v3137_v19, %v1021_v1  ;;  %2264 = vmatprep.subr.msk.bf16.mxu1 %vm1421_vm1, %v3370_v11  ;;  %v1301_v10 = vmax.f32 %v1019_v24, 0.0  ;;  %v1528_v1 = vsel %vm1421_vm1, %v3392_v25, 0 }
 0x17c   :  { %v1304_v6 = vmax.f32 %v1030_v0, 0.0 }
 0x17d   :  { %v1302_v4 = vmax.f32 %v1022_v2, 0.0 }
 0x17e   :  { %v3413_v14 = vpack.c.bf16 %v1304_v6, %v1303_v5 }
 0x17f   :  { %v3415_v12 = vpack.c.bf16 %v1302_v4, %v1301_v10  ;;  %v2203_v15 = vpop.f32.mrb[80].mxu0 }
 0x180   :  { %v1043_v9 = vadd.f32 %v2203_v15, %v3137_v19  ;;  %v1034_v7 = vpop.f32.mrb[81].mxu0 }
 0x181   :  { %v1035_v39 = vadd.f32 %v3137_v19, %v1034_v7  ;;  %v2204_v16 = vpop.f32.mrb[82].mxu0 }
 0x182   :  { %v1046_v11 = vadd.f32 %v2204_v16, %v3137_v19  ;;  %v1037_v18 = vpop.f32.mrb[83].mxu0  ;;  %2078 = vmatpush3.bf16.xpose.msra.mxu1 %v1495_v17  ;;  %v1307_v21 = vmax.f32 %v1043_v9, 0.0 }
 0x183   :  { %v1038_v20 = vadd.f32 %v3137_v19, %v1037_v18  ;;  %v1305_v23 = vmax.f32 %v1035_v39, 0.0 }
 0x184   :  { %v1308_v22 = vmax.f32 %v1046_v11, 0.0 }
 0x185   :  { %v1306_v26 = vmax.f32 %v1038_v20, 0.0  ;;  %v1531_v20 = vsel %vm1421_vm1, %v3390_v44, 0 }
 0x186   :  { %v1396_v27 = vpack.c.bf16 %v1308_v22, %v1307_v21 }
 0x187   :  { %v1395_v29 = vpack.c.bf16 %v1306_v26, %v1305_v23  ;;  %v2207_v30 = vpop.f32.mrb[84].mxu0 }
 0x188   :  { %v1059_v38 = vadd.f32 %v2207_v30, %v3137_v19  ;;  %v1050_v3 = vpop.f32.mrb[85].mxu0 }
 0x189   :  { %v1051_v31 = vadd.f32 %v3137_v19, %v1050_v3  ;;  %v2208_v32 = vpop.f32.mrb[86].mxu0  ;;  %2080 = vmatmul.mubr.msk.bf16.vlgmr.msra.gmra.mrb[4].mxu1 %vm1421_vm1, %v3053_v42  ;;  %2265 = vmatprep.subr.msk.bf16.mxu1 %vm1421_vm1, %v1395_v29 }
 0x18a   :  { %v1062_v33 = vadd.f32 %v2208_v32, %v3137_v19  ;;  %v1053_v34 = vpop.f32.mrb[87].mxu0  ;;  %2082 = vmatpush3.bf16.xpose.msra.mxu1 %v1522_v8  ;;  %2097 = vmatprep.mubr.msk.bf16.mxu1 %vm1421_vm1, %v3053_v42  ;;  %v1311_v36 = vmax.f32 %v1059_v38, 0.0 }
 0x18b   :  { %v1054_v35 = vadd.f32 %v3137_v19, %v1053_v34  ;;  %2266 = vmatprep.subr.msk.bf16.mxu1 %vm1421_vm1, %v1396_v27  ;;  %v1309_v40 = vmax.f32 %v1051_v31, 0.0  ;;  %v1534_v34 = vsel %vm1421_vm1, %v3403_v49, 0 }
 0x18c   :  { %v1312_v37 = vmax.f32 %v1062_v33, 0.0 }
 0x18d   :  { %v1310_v51 = vmax.f32 %v1054_v35, 0.0 }
 0x18e   :  { %v1398_v41 = vpack.c.bf16 %v1312_v37, %v1311_v36 }
 0x18f   :  { %v1397_v45 = vpack.c.bf16 %v1310_v51, %v1309_v40  ;;  %v2211_v57 = vpop.f32.mrb[88].mxu0 }
 0x190   :  { %v1075_v28 = vadd.f32 %v2211_v57, %v3137_v19  ;;  %v1066_v46 = vpop.f32.mrb[89].mxu0 }
 0x191   :  { %v1067_v47 = vadd.f32 %v3137_v19, %v1066_v46  ;;  %v2212_v48 = vpop.f32.mrb[90].mxu0 }
 0x192   :  { %v1078_v52 = vadd.f32 %v2212_v48, %v3137_v19  ;;  %v1069_v53 = vpop.f32.mrb[91].mxu0  ;;  %2084 = vmatpush3.bf16.xpose.msra.mxu1 %v1525_v50  ;;  %v1315_v55 = vmax.f32 %v1075_v28, 0.0 }
 0x193   :  { %v1070_v54 = vadd.f32 %v3137_v19, %v1069_v53  ;;  %2267 = vmatprep.subr.msk.bf16.mxu1 %vm1421_vm1, %v1397_v45  ;;  %v1313_v59 = vmax.f32 %v1067_v47, 0.0 }
 0x194   :  { %v1316_v58 = vmax.f32 %v1078_v52, 0.0  ;;  %v1537_v52 = vsel %vm1421_vm1, %v3401_v43, 0  ;;  %v3487_v43 = vld [vmem:[%s3577_s3] ss:$0 sm:$0xff] }
 0x195   :  { %v1314_v60 = vmax.f32 %v1070_v54, 0.0 }
 0x196   :  { %v1400_v61 = vpack.c.bf16 %v1316_v58, %v1315_v55 }
 0x197   :  { %v1399_v56 = vpack.c.bf16 %v1314_v60, %v1313_v59  ;;  %v2215_v24 = vpop.f32.mrb[92].mxu0 }
 0x198   :  { %v1091_v62 = vadd.f32 %v2215_v24, %v3137_v19  ;;  %v1082_v63 = vpop.f32.mrb[93].mxu0 }
 0x199   :  { %v1083_v13 = vadd.f32 %v3137_v19, %v1082_v63  ;;  %v2216_v0 = vpop.f32.mrb[94].mxu0 }
 0x19a   :  { %v1094_v2 = vadd.f32 %v2216_v0, %v3137_v19  ;;  %v1085_v5 = vpop.f32.mrb[95].mxu0  ;;  %2086 = vmatpush3.bf16.xpose.msra.mxu1 %v1528_v1  ;;  %v1319_v10 = vmax.f32 %v1091_v62, 0.0  ;;  %v1540_v1 = vsel %vm1421_vm1, %v3415_v12, 0 }
 0x19b   :  { %v1086_v6 = vadd.f32 %v3137_v19, %v1085_v5  ;;  %2268 = vmatprep.subr.msk.bf16.mxu1 %vm1421_vm1, %v1398_v41  ;;  %v1317_v15 = vmax.f32 %v1083_v13, 0.0 }
 0x19c   :  { %v1320_v4 = vmax.f32 %v1094_v2, 0.0 }
 0x19d   :  { %v1318_v9 = vmax.f32 %v1086_v6, 0.0 }
 0x19e   :  { %v3449_v7 = vpack.c.bf16 %v1320_v4, %v1319_v10 }
 0x19f   :  { %v1401_v39 = vpack.c.bf16 %v1318_v9, %v1317_v15  ;;  %v2219_v16 = vpop.f32.mrb[96].mxu0 }
 0x1a0   :  { %v1107_v17 = vadd.f32 %v2219_v16, %v3137_v19  ;;  %v1098_v11 = vpop.f32.mrb[97].mxu0 }
 0x1a1   :  { %v1099_v25 = vadd.f32 %v3137_v19, %v1098_v11  ;;  %v2220_v18 = vpop.f32.mrb[98].mxu0 }
 0x1a2   :  { %v1110_v21 = vadd.f32 %v2220_v18, %v3137_v19  ;;  %v1101_v22 = vpop.f32.mrb[99].mxu0  ;;  %2088 = vmatpush3.bf16.xpose.msra.mxu1 %v1531_v20  ;;  %v1323_v26 = vmax.f32 %v1107_v17, 0.0  ;;  %v1543_v20 = vsel %vm1421_vm1, %v3413_v14, 0 }
 0x1a3   :  { %v1102_v23 = vadd.f32 %v3137_v19, %v1101_v22  ;;  %2269 = vmatprep.subr.msk.bf16.mxu1 %vm1421_vm1, %v1399_v56  ;;  %v1321_v29 = vmax.f32 %v1099_v25, 0.0 }
 0x1a4   :  { %v1324_v27 = vmax.f32 %v1110_v21, 0.0 }
 0x1a5   :  { %v1322_v30 = vmax.f32 %v1102_v23, 0.0 }
 0x1a6   :  { %v3458_v38 = vpack.c.bf16 %v1324_v27, %v1323_v26 }
 0x1a7   :  { %v3460_v3 = vpack.c.bf16 %v1322_v30, %v1321_v29  ;;  %v2223_v31 = vpop.f32.mrb[100].mxu0 }
 0x1a8   :  { %v1123_v32 = vadd.f32 %v2223_v31, %v3137_v19  ;;  %v1114_v44 = vpop.f32.mrb[101].mxu0 }
 0x1a9   :  { %v1115_v8 = vadd.f32 %v3137_v19, %v1114_v44  ;;  %v2224_v33 = vpop.f32.mrb[102].mxu0  ;;  %v1570_v14 = vsel %vm1421_vm1, %v3460_v3, 0 }
 0x1aa   :  { %v1126_v35 = vadd.f32 %v2224_v33, %v3137_v19  ;;  %v1117_v36 = vpop.f32.mrb[103].mxu0  ;;  %2090 = vmatpush3.bf16.xpose.msra.mxu1 %v1534_v34  ;;  %v1327_v40 = vmax.f32 %v1123_v32, 0.0 }
 0x1ab   :  { %v1118_v37 = vadd.f32 %v3137_v19, %v1117_v36  ;;  %2270 = vmatprep.subr.msk.bf16.mxu1 %vm1421_vm1, %v1400_v61  ;;  %v1325_v41 = vmax.f32 %v1115_v8, 0.0 }
 0x1ac   :  { %v1328_v51 = vmax.f32 %v1126_v35, 0.0 }
 0x1ad   :  { %v1326_v45 = vmax.f32 %v1118_v37, 0.0 }
 0x1ae   :  { %v3469_v57 = vpack.c.bf16 %v1328_v51, %v1327_v40 }
 0x1af   :  { %v3471_v28 = vpack.c.bf16 %v1326_v45, %v1325_v41  ;;  %v2227_v46 = vpop.f32.mrb[104].mxu0 }
 0x1b0   :  { %v1139_v47 = vadd.f32 %v2227_v46, %v3137_v19  ;;  %v1130_v49 = vpop.f32.mrb[105].mxu0 }
 0x1b1   :  { %v1131_v48 = vadd.f32 %v3137_v19, %v1130_v49  ;;  %v2228_v50 = vpop.f32.mrb[106].mxu0 }
 0x1b2   :  { %v1142_v53 = vadd.f32 %v2228_v50, %v3137_v19  ;;  %v1133_v54 = vpop.f32.mrb[107].mxu0  ;;  %2092 = vmatpush3.bf16.xpose.msra.mxu1 %v1537_v52  ;;  %v1331_v58 = vmax.f32 %v1139_v47, 0.0  ;;  %v1573_v50 = vsel %vm1421_vm1, %v3458_v38, 0 }
 0x1b3   :  { %v1134_v55 = vadd.f32 %v3137_v19, %v1133_v54  ;;  %2271 = vmatprep.subr.msk.bf16.mxu1 %vm1421_vm1, %v1401_v39  ;;  %v1329_v60 = vmax.f32 %v1131_v48, 0.0 }
 0x1b4   :  { %v1332_v59 = vmax.f32 %v1142_v53, 0.0 }
 0x1b5   :  { %v1330_v61 = vmax.f32 %v1134_v55, 0.0 }
 0x1b6   :  { %v3480_v56 = vpack.c.bf16 %v1332_v59, %v1331_v58 }
 0x1b7   :  { %v3482_v24 = vpack.c.bf16 %v1330_v61, %v1329_v60  ;;  %v2231_v62 = vpop.f32.mrb[108].mxu0 }
 0x1b8   :  { %v1155_v63 = vadd.f32 %v3487_v43, %v2231_v62  ;;  %v1146_v13 = vpop.f32.mrb[109].mxu0 }
 0x1b9   :  { %v1147_v19 = vadd.f32 %v3487_v43, %v1146_v13  ;;  %v2232_v0 = vpop.f32.mrb[110].mxu0 }
 0x1ba   :  { %v1158_v2 = vadd.f32 %v3487_v43, %v2232_v0  ;;  %v1149_v5 = vpop.f32.mrb[111].mxu0  ;;  %2094 = vmatpush3.bf16.xpose.msra.mxu1 %v1540_v1  ;;  %v1335_v10 = vmax.f32 %v1155_v63, 0.0  ;;  %v1576_v1 = vsel %vm1421_vm1, %v3471_v28, 0  ;;  %v1579_v28 = vsel %vm1421_vm1, %v3469_v57, 0 }
 0x1bb   :  { %v1150_v6 = vadd.f32 %v3487_v43, %v1149_v5  ;;  %2272 = vmatprep.subr.msk.bf16.mxu1 %vm1421_vm1, %v3449_v7  ;;  %v1333_v15 = vmax.f32 %v1147_v19, 0.0 }
 0x1bc   :  { %v1336_v4 = vmax.f32 %v1158_v2, 0.0 }
 0x1bd   :  { %v1334_v9 = vmax.f32 %v1150_v6, 0.0 }
 0x1be   :  { %v3497_v39 = vpack.c.bf16 %v1336_v4, %v1335_v10 }
 0x1bf   :  { %v3499_v16 = vpack.c.bf16 %v1334_v9, %v1333_v15  ;;  %v2235_v17 = vpop.f32.mrb[112].mxu0 }
 0x1c0   :  { %v1171_v12 = vadd.f32 %v3487_v43, %v2235_v17  ;;  %v1162_v11 = vpop.f32.mrb[113].mxu0  ;;  %v1591_v57 = vsel %vm1421_vm1, %v3497_v39, 0 }
 0x1c1   :  { %v1163_v25 = vadd.f32 %v3487_v43, %v1162_v11  ;;  %v2236_v18 = vpop.f32.mrb[114].mxu0 }
 0x1c2   :  { %v1174_v7 = vadd.f32 %v3487_v43, %v2236_v18  ;;  %v1165_v21 = vpop.f32.mrb[115].mxu0  ;;  %2096 = vmatpush3.bf16.xpose.msra.mxu1 %v1543_v20  ;;  %v1339_v23 = vmax.f32 %v1171_v12, 0.0  ;;  %v1582_v18 = vsel %vm1421_vm1, %v3482_v24, 0  ;;  %v1585_v20 = vsel %vm1421_vm1, %v3480_v56, 0 }
 0x1c3   :  { %v1166_v22 = vadd.f32 %v3487_v43, %v1165_v21  ;;  %v1337_v27 = vmax.f32 %v1163_v25, 0.0  ;;  %v3552_v56 = vstv %s3579_s5  ;;  %s2341_s5 = smov [#allocation3]  }
 0x1c4   :  { %v1340_v26 = vmax.f32 %v1174_v7, 0.0  ;;  %s1894_s17 = sshll.u32 %s2341_s5, 4  ;;  %s1895_s17 = int_to_ptr.vmem [resolvable:$true] %s1894_s17 }
 0x1c5   :  { %v1338_v29 = vmax.f32 %v1166_v22, 0.0  ;;  %s2316_s18 = scalar_lea.vmem %s1895_s17, 128  ;;  %p2321_p1 = scmp.lt.s32.totalorder %s1895_s17, %s1895_s17 }
 0x1c6   :  { %v1412_v30 = vpack.c.bf16 %v1340_v26, %v1339_v23  ;;  %p2317_p0 = scmp.ne.s32.totalorder %s1895_s17, %s2316_s18  ;;  %p2322_p2 = scmp.lt.s32.totalorder %s2316_s18, %s2316_s18 }
 0x1c7   :  { %v1411_v31 = vpack.c.bf16 %v1338_v29, %v1337_v27  ;;  %v2239_v32 = vpop.f32.mrb[116].mxu0 }
 0x1c8   :  { %v1187_v44 = vadd.f32 %v3487_v43, %v2239_v32  ;;  %v1178_v8 = vpop.f32.mrb[117].mxu0  ;;  %p2323_p3 = por %p2322_p2, %p2321_p1 }
 0x1c9   :  { %2098 = vmatmul.mubr.msk.bf16.vlgmr.msra.gmra.mrb[8].mxu1 %vm1421_vm1, %v3053_v42  ;;  %2273 = vmatprep.subr.msk.bf16.mxu1 %vm1421_vm1, %v1411_v31  ;;  %v1179_v33 = vadd.f32 %v3487_v43, %v1178_v8  ;;  %v2240_v34 = vpop.f32.mrb[118].mxu0 }
 0x1ca   :  { %2100 = vmatpush3.bf16.xpose.msra.mxu1 %v1570_v14  ;;  %v1343_v35 = vmax.f32 %v1187_v44, 0.0  ;;  %v1190_v36 = vadd.f32 %v3487_v43, %v2240_v34  ;;  %v1181_v37 = vpop.f32.mrb[119].mxu0  ;;  %2115 = vmatprep.mubr.msk.bf16.mxu1 %vm1421_vm1, %v3053_v42  ;;  %p2324_p4 = pnand %p2323_p3, %p2317_p0 }
 0x1cb   :  { %2274 = vmatprep.subr.msk.bf16.mxu1 %vm1421_vm1, %v1412_v30  ;;  %v1341_v40 = vmax.f32 %v1179_v33, 0.0  ;;  %v1182_v51 = vadd.f32 %v3487_v43, %v1181_v37 }
 0x1cc   :  { %v1344_v41 = vmax.f32 %v1190_v36, 0.0 }
 0x1cd   :  { %v1342_v45 = vmax.f32 %v1182_v51, 0.0 }
 0x1ce   :  { %v1414_v46 = vpack.c.bf16 %v1344_v41, %v1343_v35 }
 0x1cf   :  { %v1413_v3 = vpack.c.bf16 %v1342_v45, %v1341_v40  ;;  %v2243_v47 = vpop.f32.mrb[120].mxu0 }
 0x1d0   :  { %v1203_v49 = vadd.f32 %v3487_v43, %v2243_v47  ;;  %v1194_v48 = vpop.f32.mrb[121].mxu0 }
 0x1d1   :  { %v1195_v52 = vadd.f32 %v3487_v43, %v1194_v48  ;;  %v2244_v53 = vpop.f32.mrb[122].mxu0 }
 0x1d2   :  { %2102 = vmatpush3.bf16.xpose.msra.mxu1 %v1573_v50  ;;  %v1347_v54 = vmax.f32 %v1203_v49, 0.0  ;;  %v1206_v55 = vadd.f32 %v3487_v43, %v2244_v53  ;;  %v1197_v58 = vpop.f32.mrb[123].mxu0  ;;  %v1844_v49 = vlaneseq }
 0x1d3   :  { %2275 = vmatprep.subr.msk.bf16.mxu1 %vm1421_vm1, %v1413_v3  ;;  %v1345_v59 = vmax.f32 %v1195_v52, 0.0  ;;  %v1198_v60 = vadd.f32 %v3487_v43, %v1197_v58  ;;  %v2340_v3 = vmov 1966171168  }
 0x1d4   :  { %v1348_v61 = vmax.f32 %v1206_v55, 0.0  ;;  %v1842_v47 = vunpack.c.l.s4 %v2340_v3  ;;  %v1845_v50 = vshrl.u32 %v1844_v49, 7 }
 0x1d5   :  { %v1346_v62 = vmax.f32 %v1198_v60, 0.0 }
 0x1d6   :  { %v1416_v63 = vpack.c.bf16 %v1348_v61, %v1347_v54  ;;  %v1843_v48 = vunpack.c.0.s8 %v1842_v47 }
 0x1d7   :  { %v1415_v13 = vpack.c.bf16 %v1346_v62, %v1345_v59  ;;  %v2247_v19 = vpop.f32.mrb[124].mxu0 }
 0x1d8   :  { %v1219_v38 = vadd.f32 %v3487_v43, %v2247_v19  ;;  %v1210_v0 = vpop.f32.mrb[125].mxu0  ;;  %v1846_v53 = vsub.s32 %v1843_v48, %v1845_v50 }
 0x1d9   :  { %v1211_v2 = vadd.f32 %v3487_v43, %v1210_v0  ;;  %v2248_v5 = vpop.f32.mrb[126].mxu0 }
 0x1da   :  { %2104 = vmatpush3.bf16.xpose.msra.mxu1 %v1576_v1  ;;  %v1351_v6 = vmax.f32 %v1219_v38, 0.0  ;;  %v1222_v10 = vadd.f32 %v3487_v43, %v2248_v5  ;;  %v1213_v4 = vpop.f32.mrb[127].mxu0 }
 0x1db   :  { %2276 = vmatprep.subr.msk.bf16.mxu1 %vm1421_vm1, %v1414_v46  ;;  %v1349_v15 = vmax.f32 %v1211_v2, 0.0  ;;  %v1214_v9 = vadd.f32 %v3487_v43, %v1213_v4  ;;  %v1588_v43 = vsel %vm1421_vm1, %v3499_v16, 0 }
 0x1dc   :  { %v1352_v17 = vmax.f32 %v1222_v10, 0.0 }
 0x1dd   :  { %v1350_v12 = vmax.f32 %v1214_v9, 0.0 }
 0x1de   :  { %v1418_v11 = vpack.c.bf16 %v1352_v17, %v1351_v6 }
 0x1df   :  { %v1417_v25 = vpack.c.bf16 %v1350_v12, %v1349_v15 }
 0x1e2   :  { %2106 = vmatpush3.bf16.xpose.msra.mxu1 %v1579_v28 }
 0x1e3   :  { %2277 = vmatprep.subr.msk.bf16.mxu1 %vm1421_vm1, %v1415_v13 }
 0x1ea   :  { %2108 = vmatpush3.bf16.xpose.msra.mxu1 %v1582_v18 }
 0x1eb   :  { %2278 = vmatprep.subr.msk.bf16.mxu1 %vm1421_vm1, %v1416_v63 }
 0x1f2   :  { %2110 = vmatpush3.bf16.xpose.msra.mxu1 %v1585_v20 }
 0x1f3   :  { %2279 = vmatprep.subr.msk.bf16.mxu1 %vm1421_vm1, %v1417_v25 }
 0x1fa   :  { %2112 = vmatpush3.bf16.xpose.msra.mxu1 %v1588_v43 }
 0x1fb   :  { %2280 = vmatprep.subr.msk.bf16.mxu1 %vm1421_vm1, %v1418_v11 }
 0x202   :  { %2114 = vmatpush3.bf16.xpose.msra.mxu1 %v1591_v57 }
 0x209   :  { %2116 = vmatmul.mubr.msk.bf16.vlgmr.msra.gmra.mrb[12].mxu1 %vm1421_vm1, %v3053_v42 }
 0x21c   :  { %v1651_v24 = vpop.f32.mrb[0].mxu1 }
 0x21d   :  { %v1652_v7 = vadd.f32 %v1651_v24, %v3552_v56  ;;  %v1653_v21 = vpop.f32.mrb[1].mxu1 }
 0x21e   :  { %v1654_v16 = vadd.f32 %v1653_v21, %v3552_v56  ;;  %v1655_v22 = vpop.f32.mrb[2].mxu1 }
 0x21f   :  { %v1971_v23 = vmul.f32 -1.442695, %v1652_v7  ;;  %v1656_v26 = vpop.f32.mrb[3].mxu1 }
 0x220   :  { %v1972_v27 = vmul.f32 -1.442695, %v1654_v16 }
 0x221   :  { %2283 = vpow2.f32 %v1971_v23 }
 0x222   :  { %2285 = vpow2.f32 %v1972_v27 }
 0x22b   :  { %v2284_v39 = vpop.eup %2283 }
 0x22c   :  { %v2286_v29 = vpop.eup %2285  ;;  %v1805_v42 = vadd.f32 1.0, %v2284_v39 }
 0x22d   :  { %v1806_v30 = vadd.f32 1.0, %v2286_v29 }
 0x22e   :  { %2287 = vrcp.f32 %v1805_v42 }
 0x22f   :  { %2289 = vrcp.f32 %v1806_v30 }
 0x238   :  { %v2288_v31 = vpop.eup %2287 }
 0x239   :  { %v2290_v32 = vpop.eup %2289 }
 0x23a   :  { %v1837_v44 = vcombine.low %v2288_v31, %v2290_v32 }
 0x23c   :  { %v1847_v58 = vrot.slane %v1837_v44, %v1846_v53 }
 0x25c   :  { %v1692_v8 = vpop.f32.mrb[4].mxu1 }
 0x25d   :  { %v1693_v14 = vadd.f32 %v1692_v8, %v3552_v56  ;;  %v1694_v33 = vpop.f32.mrb[5].mxu1 }
 0x25e   :  { %v1695_v34 = vadd.f32 %v1694_v33, %v3552_v56  ;;  %v1696_v35 = vpop.f32.mrb[6].mxu1 }
 0x25f   :  { %v1973_v36 = vmul.f32 -1.442695, %v1693_v14  ;;  %v1697_v37 = vpop.f32.mrb[7].mxu1 }
 0x260   :  { %v1974_v40 = vmul.f32 -1.442695, %v1695_v34 }
 0x261   :  { %2291 = vpow2.f32 %v1973_v36 }
 0x262   :  { %2293 = vpow2.f32 %v1974_v40 }
 0x26b   :  { %v2292_v51 = vpop.eup %2291 }
 0x26c   :  { %v2294_v41 = vpop.eup %2293  ;;  %v1807_v45 = vadd.f32 1.0, %v2292_v51 }
 0x26d   :  { %v1808_v46 = vadd.f32 1.0, %v2294_v41 }
 0x26e   :  { %2295 = vrcp.f32 %v1807_v45 }
 0x26f   :  { %2297 = vrcp.f32 %v1808_v46 }
 0x278   :  { %v2296_v52 = vpop.eup %2295 }
 0x279   :  { %v2298_v54 = vpop.eup %2297 }
 0x27a   :  { %v1838_v55 = vcombine.low %v2296_v52, %v2298_v54 }
 0x27c   :  { %v1854_v59 = vrot.slane %v1838_v55, %v1846_v53 }
 0x27e   :  { %v1869_v60 = vcombine.low %v1847_v58, %v1854_v59 }
 0x29c   :  { %v1733_v61 = vpop.f32.mrb[8].mxu1 }
 0x29d   :  { %v1734_v62 = vadd.f32 %v1733_v61, %v3552_v56  ;;  %v1735_v63 = vpop.f32.mrb[9].mxu1 }
 0x29e   :  { %v1736_v13 = vadd.f32 %v1735_v63, %v3552_v56  ;;  %v1737_v19 = vpop.f32.mrb[10].mxu1 }
 0x29f   :  { %v1975_v38 = vmul.f32 -1.442695, %v1734_v62  ;;  %v1738_v0 = vpop.f32.mrb[11].mxu1 }
 0x2a0   :  { %v1976_v1 = vmul.f32 -1.442695, %v1736_v13 }
 0x2a1   :  { %2299 = vpow2.f32 %v1975_v38 }
 0x2a2   :  { %2301 = vpow2.f32 %v1976_v1 }
 0x2ab   :  { %v2300_v2 = vpop.eup %2299 }
 0x2ac   :  { %v2302_v5 = vpop.eup %2301  ;;  %v1809_v6 = vadd.f32 1.0, %v2300_v2 }
 0x2ad   :  { %v1810_v10 = vadd.f32 1.0, %v2302_v5 }
 0x2ae   :  { %2303 = vrcp.f32 %v1809_v6 }
 0x2af   :  { %2305 = vrcp.f32 %v1810_v10 }
 0x2b8   :  { %v2304_v4 = vpop.eup %2303 }
 0x2b9   :  { %v2306_v15 = vpop.eup %2305 }
 0x2ba   :  { %v1839_v9 = vcombine.low %v2304_v4, %v2306_v15 }
 0x2bc   :  { %v1861_v26 = vrot.slane %v1839_v9, %v1846_v53 }
 0x2dc   :  { %v1774_v17 = vpop.f32.mrb[12].mxu1 }
 0x2dd   :  { %v1775_v12 = vadd.f32 %v1774_v17, %v3552_v56  ;;  %v1776_v11 = vpop.f32.mrb[13].mxu1 }
 0x2de   :  { %v1777_v25 = vadd.f32 %v1776_v11, %v3552_v56  ;;  %v1778_v28 = vpop.f32.mrb[14].mxu1  ;;  %v1877_v56 = vrot.slane %v1869_v60, %v1846_v53 }
 0x2df   :  { %v1977_v18 = vmul.f32 -1.442695, %v1775_v12  ;;  %v1779_v20 = vpop.f32.mrb[15].mxu1 }
 0x2e0   :  { %v1978_v43 = vmul.f32 -1.442695, %v1777_v25 }
 0x2e1   :  { %2307 = vpow2.f32 %v1977_v18 }
 0x2e2   :  { %2309 = vpow2.f32 %v1978_v43 }
 0x2eb   :  { %v2308_v57 = vpop.eup %2307 }
 0x2ec   :  { %v2310_v24 = vpop.eup %2309  ;;  %v1811_v7 = vadd.f32 1.0, %v2308_v57 }
 0x2ed   :  { %v1812_v21 = vadd.f32 1.0, %v2310_v24 }
 0x2ee   :  { %2311 = vrcp.f32 %v1811_v7 }
 0x2ef   :  { %2313 = vrcp.f32 %v1812_v21 }
 0x2f8   :  { %v2312_v16 = vpop.eup %2311 }
 0x2f9   :  { %v2314_v22 = vpop.eup %2313 }
 0x2fa   :  { %v1840_v23 = vcombine.low %v2312_v16, %v2314_v22 }
 0x2fc   :  { %v1868_v27 = vrot.slane %v1840_v23, %v1846_v53 }
 0x2fe   :  { %v1870_v39 = vcombine.low %v1861_v26, %v1868_v27 }
 0x300   :  { %v1884_v29 = vrot.slane %v1870_v39, %v1846_v53 }
 0x302   :  { %v1885_v42 = vcombine.low %v1877_v56, %v1884_v29 }
 0x304   :  { %1887 = vst [vmem:[#allocation3] sm:$0xff] %v1885_v42 }
 0x305   :  { %2327 = shalt.err (!%p2324_p4)
}
 0x306   :  { %s2328_s20 = scalar_lea.hbm %s3580_s6, 128 }
 0x307   :  { %p2329_p5 = scmp.ne.s32.totalorder %s3580_s6, %s2328_s20  ;;  %p2332_p6 = scmp.lt.u32.totalorder %s2328_s20, %s3580_s6 }
 0x309   :  { %p2334_p7 = pnand %p2332_p6, %p2329_p5 }
 0x30b   :  { %2337 = shalt.err (!%p2334_p7)
}
 0x30c   :  { %1897 = dma.vmem_to_hbm [thread:$0]  %s1895_s17, 128, %s3580_s6, [#allocation4]  }
 0x30d   :  { %2338 = dma.done.wait [#allocation4], 128  }
 0x30e   :  { %2339 = vsyncadd [#allocation4], 4294967168 }
 0x30f   :  { %1901 = vsyncpa [#allocation4], 1 }

</bundles_post_ra>
